<compile_context>
chip_gen: v7x
topology: tpu7x:2x2x1
jax: 0.10.0
libtpu: 0.0.40
codegen_flags: <defaults>
</compile_context>

<pallas_src>
import functools

import jax
import jax.numpy as jnp
from jax.experimental import pallas as pl
from jax.experimental.pallas import tpu as pltpu


# --------------------------------------------------------------------------
# Generation-aware sizing helpers
# --------------------------------------------------------------------------
def _round_up(x, m):
    return ((x + m - 1) // m) * m


def _vmem_capacity_bytes():
    try:
        cap = getattr(pltpu.get_tpu_info(), "vmem_capacity_bytes", None)
        if cap:
            return int(cap)
    except Exception:
        pass
    return 64 << 20          # conservative default (v7x per-TC VMEM)


def _vmem_limit_bytes():
    cap = _vmem_capacity_bytes()
    return int(min(cap * 3 // 4, 100 << 20))   # ~96 MiB on v5e/v6e, ~48 MiB on v7x


# --------------------------------------------------------------------------
# Kernel A: fused visual MLP + squared distance + masked snippet pooling
# --------------------------------------------------------------------------
def _make_visual_kernel(S):
    """Build a kernel processing S visual streams per grid step."""
    def kernel(*refs):
        feat_refs = refs[:S]                       # S x (bt, N, Dv) bf16
        lemb_ref = refs[S]                         # (bt, Ep) f32
        mask_refs = refs[S + 1:2 * S + 1]          # S x (bt, N) f32
        w1_ref, b1_ref, w2_ref, b2_ref, o_ref = refs[2 * S + 1:]

        bt, N, Dv = feat_refs[0].shape
        Ep = w2_ref.shape[1]

        # Weights / language embedding loaded once, reused for all S streams.
        w1 = w1_ref[...]
        b1 = b1_ref[...]
        w2 = w2_ref[...]
        b2 = b2_ref[...]
        l = lemb_ref[...]                                        # (bt, Ep) f32
        l_sq = jnp.sum(l * l, axis=-1, keepdims=True)            # (bt, 1)

        for s in range(S):
            # MLP on flattened (bt*N, Dv) snippet rows; bf16 MXU, f32 accumulation.
            x = feat_refs[s][...].reshape(bt * N, Dv)            # bf16
            h = jnp.dot(x, w1, preferred_element_type=jnp.float32) + b1
            h = jnp.maximum(h, 0.0)                              # ReLU (dropout = identity)
            v = (jnp.dot(h.astype(jnp.bfloat16), w2,
                         preferred_element_type=jnp.float32) + b2).reshape(bt, N, Ep)

            # ||l - v||^2 = ||v||^2 - 2 v.l + ||l||^2  (padded E channels are zero).
            v_sq = jnp.sum(v * v, axis=-1)                       # (bt, N)
            vl = jnp.sum(v * l[:, None, :], axis=-1)             # (bt, N)
            d = v_sq - 2.0 * vl + l_sq                           # (bt, N)

            # Masked mean pooling over snippets (max-guard only matters for
            # zero-padded batch rows, which are sliced away in the wrapper).
            m = mask_refs[s][...]                                # (bt, N)
            k = jnp.maximum(jnp.sum(m, axis=-1, keepdims=True), 1.0)
            pooled = jnp.sum(d * m, axis=-1, keepdims=True) / k  # (bt, 1)
            o_ref[0, s, :] = pooled[:, 0]                        # lane-dense row store

    return kernel


def _pick_visual_block(B, N, Dv, n_streams):
    """Batch tile so that S double-buffered bf16 feature tiles fit VMEM comfortably."""
    cap = _vmem_capacity_bytes()
    budget = max(512 << 10, cap // (8 * max(n_streams, 1)))   # per-stream per-buffer bytes
    rows = max(1, budget // max(2 * N * Dv, 1))
    if rows >= B:
        return B, B
    bt = max(8, (rows // 8) * 8)
    return bt, _round_up(B, bt)


def fused_visual_compare_pool(feats, l_emb, masks, vp):
    """feats: list of (B,N,Dv); l_emb: (B,Ep); masks: list of (B,N) -> (S, B) distances."""
    S = len(feats)
    B, N, Dv = feats[0].shape
    Hvp = vp["w1"].shape[1]
    Ep = vp["w2"].shape[1]
    bt, Bp = _pick_visual_block(B, N, Dv, S)
    nb = Bp // bt

    def pad_b(x):
        if Bp == B:
            return x
        return jnp.pad(x, ((0, Bp - B),) + ((0, 0),) * (x.ndim - 1))

    # Features DMA'd as bf16 (ideally the producer already emits bf16 so this fuses).
    feats_b = [pad_b(f.astype(jnp.bfloat16)) for f in feats]
    masks_b = [pad_b(m.astype(jnp.float32)) for m in masks]
    lemb_b = pad_b(l_emb)

    feat_spec = pl.BlockSpec((bt, N, Dv), lambda j: (j, 0, 0))
    mask_spec = pl.BlockSpec((bt, N), lambda j: (j, 0))
    in_specs = (
        [feat_spec] * S
        + [pl.BlockSpec((bt, Ep), lambda j: (j, 0))]
        + [mask_spec] * S
        + [pl.BlockSpec((Dv, Hvp), lambda j: (0, 0)),   # weights: VMEM-resident
           pl.BlockSpec((1, Hvp), lambda j: (0, 0)),
           pl.BlockSpec((Hvp, Ep), lambda j: (0, 0)),
           pl.BlockSpec((1, Ep), lambda j: (0, 0))]
    )

    out = pl.pallas_call(
        _make_visual_kernel(S),
        out_shape=jax.ShapeDtypeStruct((nb, S, bt), jnp.float32),
        grid=(nb,),
        in_specs=in_specs,
        out_specs=pl.BlockSpec((1, S, bt), lambda j: (j, 0, 0)),
        compiler_params=pltpu.CompilerParams(
            dimension_semantics=("parallel",),
            vmem_limit_bytes=_vmem_limit_bytes()),
    )(*feats_b, lemb_b, *masks_b, vp["w1"], vp["b1"], vp["w2"], vp["b2"])

    # (nb, S, bt) -> (S, Bp) -> (S, B)
    return jnp.swapaxes(out, 0, 1).reshape(S, Bp)[:, :B]


# --------------------------------------------------------------------------
# Kernel B: LSTM recurrence (pack_padded_sequence semantics) + lang Linear
# --------------------------------------------------------------------------
def _make_lstm_kernel(bt, T, L, Hp, Ep, unroll):
    G = 4 * Hp

    def kernel(q_ref, len_ref, wih_ref, whh_ref, b_ref, wl_ref, bl_ref, o_ref, gx_ref):
        # Hoisted input projection: ONE (T*bt, L) @ (L, 4Hp) MXU matmul -> bf16 scratch.
        x = q_ref[...].reshape(T * bt, L).astype(jnp.bfloat16)          # time-major
        gx = jnp.dot(x, wih_ref[...], preferred_element_type=jnp.float32) + b_ref[...]
        gx_ref[...] = gx.reshape(T, bt, G).astype(jnp.bfloat16)
        # TODO(synk): for very large T, stream gx in T-chunks from HBM instead of one scratch.

        whh = whh_ref[...]                                              # (Hp, 4Hp) bf16
        lens_b = jnp.broadcast_to(len_ref[...], (bt, Hp))               # hoisted broadcast

        def step(t, carry):
            h, c, h_last = carry
            gates = gx_ref[t].astype(jnp.float32) + jnp.dot(
                h.astype(jnp.bfloat16), whh, preferred_element_type=jnp.float32)
            # PyTorch gate order i, f, g, o — lane-aligned slices of width Hp.
            i = jax.nn.sigmoid(gates[:, 0:Hp])
            f = jax.nn.sigmoid(gates[:, Hp:2 * Hp])
            g = jnp.tanh(gates[:, 2 * Hp:3 * Hp])
            o = jax.nn.sigmoid(gates[:, 3 * Hp:4 * Hp])
            c = f * c + i * g
            h = o * jnp.tanh(c)
            # pack_padded_sequence semantics: capture h at t == length - 1.
            h_last = jnp.where(lens_b == t + 1, h, h_last)
            return h, c, h_last

        z = jnp.zeros((bt, Hp), jnp.float32)
        _, _, h_last = jax.lax.fori_loop(0, T, step, (z, z, z), unroll=unroll)

        o_ref[...] = jnp.dot(h_last.astype(jnp.bfloat16), wl_ref[...],
                             preferred_element_type=jnp.float32) + bl_ref[...]

    return kernel


def _pick_lstm_block(B, T, Hp):
    cap = _vmem_capacity_bytes()
    budget = max(1 << 20, cap // 8)            # bf16 gx scratch budget per grid step
    per_row = max(T * 4 * Hp * 2, 1)
    rows = max(1, budget // per_row)
    if rows >= B:
        return B, B
    bt = max(8, (rows // 8) * 8)
    return bt, _round_up(B, bt)


def encode_query(padded_query, query_length, lp):
    B, T, L = padded_query.shape
    Hp = lp["whh"].shape[0]
    Ep = lp["wl"].shape[1]
    bt, Bp = _pick_lstm_block(B, T, Hp)

    q = jnp.swapaxes(padded_query, 0, 1)                      # (T, B, L) time-major
    lens = jnp.clip(query_length.astype(jnp.int32), 1, T).reshape(B, 1)
    if Bp != B:
        q = jnp.pad(q, ((0, 0), (0, Bp - B), (0, 0)))
        lens = jnp.pad(lens, ((0, Bp - B), (0, 0)), constant_values=1)

    unroll = T if T <= 8 else 8
    out = pl.pallas_call(
        _make_lstm_kernel(bt, T, L, Hp, Ep, unroll),
        out_shape=jax.ShapeDtypeStruct((Bp, Ep), jnp.float32),
        grid=(Bp // bt,),
        in_specs=[
            pl.BlockSpec((T, bt, L), lambda j: (0, j, 0)),
            pl.BlockSpec((bt, 1), lambda j: (j, 0)),
            pl.BlockSpec(lp["wih"].shape, lambda j: (0, 0)),  # weights: VMEM-resident
            pl.BlockSpec(lp["whh"].shape, lambda j: (0, 0)),
            pl.BlockSpec(lp["b"].shape, lambda j: (0, 0)),
            pl.BlockSpec(lp["wl"].shape, lambda j: (0, 0)),
            pl.BlockSpec(lp["bl"].shape, lambda j: (0, 0)),
        ],
        out_specs=pl.BlockSpec((bt, Ep), lambda j: (j, 0)),
        scratch_shapes=[pltpu.VMEM((T, bt, 4 * Hp), jnp.bfloat16)],
        compiler_params=pltpu.CompilerParams(
            dimension_semantics=("parallel",),
            vmem_limit_bytes=_vmem_limit_bytes()),
    )(q, lens, lp["wih"], lp["whh"], lp["b"], lp["wl"], lp["bl"])
    return out[:B]                                            # (B, Ep)


# --------------------------------------------------------------------------
# Parameters: matches MCN.init_parameters (bias=0, weights ~ U(-0.08, 0.08)).
# --------------------------------------------------------------------------
def init_params(key, visual_size, lang_size, embedding_size, visual_hidden, lang_hidden):
    ks = jax.random.split(key, 5)
    u = lambda k, shape: jax.random.uniform(k, shape, jnp.float32, -0.08, 0.08)
    vparams = dict(
        w1=u(ks[0], (visual_size, visual_hidden)),
        b1=jnp.zeros((1, visual_hidden), jnp.float32),
        w2=u(ks[1], (visual_hidden, embedding_size)),
        b2=jnp.zeros((1, embedding_size), jnp.float32),
    )
    lparams = dict(
        wih=u(ks[2], (lang_size, 4 * lang_hidden)),
        whh=u(ks[3], (lang_hidden, 4 * lang_hidden)),
        b=jnp.zeros((1, 4 * lang_hidden), jnp.float32),  # bias_ih + bias_hh (both zero)
        wl=u(ks[4], (lang_hidden, embedding_size)),
        bl=jnp.zeros((1, embedding_size), jnp.float32),
    )
    return vparams, lparams


def pad_visual_params(vparams):
    """Lane-pad visual_hidden and embedding_size to multiples of 128 (zero pad, exact)."""
    Dv, Hv = vparams["w1"].shape
    E = vparams["w2"].shape[1]
    Hvp, Ep = _round_up(Hv, 128), _round_up(E, 128)
    w1 = jnp.zeros((Dv, Hvp), jnp.float32).at[:, :Hv].set(vparams["w1"])
    b1 = jnp.zeros((1, Hvp), jnp.float32).at[:, :Hv].set(vparams["b1"])
    w2 = jnp.zeros((Hvp, Ep), jnp.float32).at[:Hv, :E].set(vparams["w2"])
    b2 = jnp.zeros((1, Ep), jnp.float32).at[:, :E].set(vparams["b2"])
    return dict(w1=w1.astype(jnp.bfloat16), b1=b1,
                w2=w2.astype(jnp.bfloat16), b2=b2)


def pad_lstm_params(lparams):
    """Pad hidden/embedding to multiples of 128 so gate slices are lane-aligned.
    Padded rows/columns are zero, so padded h/c channels stay exactly zero."""
    H = lparams["whh"].shape[0]
    E = lparams["wl"].shape[1]
    Hp, Ep = _round_up(H, 128), _round_up(E, 128)

    def pad_gate_cols(w):                       # (R, 4H) -> (R, 4Hp)
        out = jnp.zeros((w.shape[0], 4 * Hp), jnp.float32)
        for g in range(4):
            out = out.at[:, g * Hp:g * Hp + H].set(w[:, g * H:(g + 1) * H])
        return out

    wih = pad_gate_cols(lparams["wih"])                                      # (L, 4Hp)
    whh = jnp.zeros((Hp, 4 * Hp), jnp.float32).at[:H].set(
        pad_gate_cols(lparams["whh"]))                                       # (Hp, 4Hp)
    b = pad_gate_cols(lparams["b"])                                          # (1, 4Hp)
    wl = jnp.zeros((Hp, Ep), jnp.float32).at[:H, :E].set(lparams["wl"])      # (Hp, Ep)
    bl = jnp.zeros((1, Ep), jnp.float32).at[:, :E].set(lparams["bl"])        # (1, Ep)
    # TODO(synk): when importing pretrained PyTorch weights, transpose (4H,·) -> (·,4H)
    # and pre-sum bias_ih + bias_hh before padding.
    return dict(wih=wih.astype(jnp.bfloat16), whh=whh.astype(jnp.bfloat16),
                b=b, wl=wl.astype(jnp.bfloat16), bl=bl)


# --------------------------------------------------------------------------
# SMCN.forward
# --------------------------------------------------------------------------
def smcn_forward(padded_query, query_length, visual_pos,
                 visual_neg_intra=None, visual_neg_inter=None,
                 *, vparams_padded, lparams_padded):
    streams = [("pos", visual_pos)]
    if visual_neg_intra is not None:
        streams.append(("neg_intra", visual_neg_intra))
    if visual_neg_inter is not None:
        streams.append(("neg_inter", visual_neg_inter))

    l_emb = encode_query(padded_query, query_length, lparams_padded)       # (B, Ep)

    feats = [v["features"] for _, v in streams]
    masks = [v["mask"] for _, v in streams]
    dists = fused_visual_compare_pool(feats, l_emb, masks, vparams_padded)  # (S, B)

    results = {"pos": None, "neg_intra": None, "neg_inter": None}
    for s, (name, _) in enumerate(streams):
        results[name] = dists[s]
    return results["pos"], results["neg_intra"], results["neg_inter"]


# --------------------------------------------------------------------------
# Pure-f32 JAX reference of the PyTorch forward (for a loose correctness check)
# --------------------------------------------------------------------------
def _reference_forward(padded_query, query_length, streams, vparams, lparams):
    B, T, _ = padded_query.shape
    H = lparams["whh"].shape[0]
    lens = jnp.clip(query_length, 1, T)
    h = jnp.zeros((B, H)); c = jnp.zeros((B, H)); h_last = jnp.zeros((B, H))
    for t in range(T):
        gates = padded_query[:, t, :] @ lparams["wih"] + h @ lparams["whh"] + lparams["b"]
        i = jax.nn.sigmoid(gates[:, :H]); f = jax.nn.sigmoid(gates[:, H:2 * H])
        g = jnp.tanh(gates[:, 2 * H:3 * H]); o = jax.nn.sigmoid(gates[:, 3 * H:])
        c = f * c + i * g
        h = o * jnp.tanh(c)
        h_last = jnp.where((lens == t + 1)[:, None], h, h_last)
    l_emb = h_last @ lparams["wl"] + lparams["bl"]

    outs = []
    for feat, mask in streams:
        Bv, N, Dv = feat.shape
        hh = jnp.maximum(feat.reshape(-1, Dv) @ vparams["w1"] + vparams["b1"], 0.0)
        v = (hh @ vparams["w2"] + vparams["b2"]).reshape(Bv, N, -1)
        d = jnp.sum((l_emb[:, None, :] - v) ** 2, axis=-1)
        outs.append(jnp.sum(d * mask, axis=-1) / jnp.sum(mask, axis=-1))
    return outs


# --------------------------------------------------------------------------
if __name__ == "__main__":
    B, N, T = 2, 8, 8
    visual_size, lang_size, embedding_size = 32, 16, 8
    visual_hidden, lang_hidden = 16, 32

    key = jax.random.PRNGKey(0)
    k_param, k_q, k_p, k_ni, k_ne = jax.random.split(key, 5)

    vparams, lparams = init_params(
        k_param, visual_size, lang_size, embedding_size, visual_hidden, lang_hidden)
    vparams_p = pad_visual_params(vparams)
    lparams_p = pad_lstm_params(lparams)

    padded_query = jax.random.normal(k_q, (B, T, lang_size), jnp.float32)
    # pack_padded_sequence(enforce_sorted=True) expects descending lengths
    query_length = jnp.array([8, 5], jnp.int32)

    def mk_visual(k, n_valid):
        feat = jax.random.normal(k, (B, N, visual_size), jnp.float32)
        mask = (jnp.arange(N)[None, :] < jnp.asarray(n_valid)[:, None]).astype(jnp.float32)
        return {"features": feat, "mask": mask}

    visual_pos = mk_visual(k_p, [8, 6])
    visual_neg_intra = mk_visual(k_ni, [7, 5])
    visual_neg_inter = mk_visual(k_ne, [8, 4])

    fwd = jax.jit(functools.partial(
        smcn_forward, vparams_padded=vparams_p, lparams_padded=lparams_p))

    c_pos, c_ni, c_ne = fwd(padded_query, query_length,
                            visual_pos, visual_neg_intra, visual_neg_inter)
    jax.block_until_ready((c_pos, c_ni, c_ne))

    refs = _reference_forward(
        padded_query, query_length,
        [(visual_pos["features"], visual_pos["mask"]),
         (visual_neg_intra["features"], visual_neg_intra["mask"]),
         (visual_neg_inter["features"], visual_neg_inter["mask"])],
        vparams, lparams)

    for got, want in zip((c_pos, c_ni, c_ne), refs):
        assert got.shape == (B,)
        assert bool(jnp.all(jnp.isfinite(got)))
        # Loose tolerance: kernels run bf16 on the MXU, reference is pure f32.
        assert bool(jnp.allclose(got, want, rtol=0.25, atol=1e-2))
    print("KERNEL_OK")
</pallas_src>

<mosaic_0001>
module attributes {stable_mosaic.version = 11 : i64} {
  func.func @kernel(%arg0: i32, %arg1: memref<2x8x32xbf16, #tpu.memory_space<vmem>>, %arg2: memref<2x8x32xbf16, #tpu.memory_space<vmem>>, %arg3: memref<2x8x32xbf16, #tpu.memory_space<vmem>>, %arg4: memref<2x128xf32, #tpu.memory_space<vmem>>, %arg5: memref<2x8xf32, #tpu.memory_space<vmem>>, %arg6: memref<2x8xf32, #tpu.memory_space<vmem>>, %arg7: memref<2x8xf32, #tpu.memory_space<vmem>>, %arg8: memref<32x128xbf16, #tpu.memory_space<vmem>>, %arg9: memref<1x128xf32, #tpu.memory_space<vmem>>, %arg10: memref<128x128xbf16, #tpu.memory_space<vmem>>, %arg11: memref<1x128xf32, #tpu.memory_space<vmem>>, %arg12: memref<1x3x2xf32, #tpu.memory_space<vmem>>) attributes {dimension_semantics = [#tpu.dimension_semantics<parallel>], iteration_bounds = array<i64: 1>, scalar_prefetch = 0 : i64, scratch_operands = 0 : i64, tpu.core_type = #tpu.core_type<tc>, window_params = [{transform_indices = @transform_0, window_bounds = array<i64: 2, 8, 32>}, {transform_indices = @transform_1, window_bounds = array<i64: 2, 8, 32>}, {transform_indices = @transform_2, window_bounds = array<i64: 2, 8, 32>}, {transform_indices = @transform_3, window_bounds = array<i64: 2, 128>}, {transform_indices = @transform_4, window_bounds = array<i64: 2, 8>}, {transform_indices = @transform_5, window_bounds = array<i64: 2, 8>}, {transform_indices = @transform_6, window_bounds = array<i64: 2, 8>}, {pipeline_mode = #tpu.pipeline_mode<synchronous>, transform_indices = @transform_7, window_bounds = array<i64: 32, 128>}, {pipeline_mode = #tpu.pipeline_mode<synchronous>, transform_indices = @transform_8, window_bounds = array<i64: 1, 128>}, {pipeline_mode = #tpu.pipeline_mode<synchronous>, transform_indices = @transform_9, window_bounds = array<i64: 128, 128>}, {pipeline_mode = #tpu.pipeline_mode<synchronous>, transform_indices = @transform_10, window_bounds = array<i64: 1, 128>}, {transform_indices = @transform_11, window_bounds = array<i64: 1, 3, 2>}]} {
    %c0 = arith.constant 0 : index
    %c0_0 = arith.constant 0 : index
    %0 = vector.load %arg8[%c0, %c0_0] : memref<32x128xbf16, #tpu.memory_space<vmem>>, vector<32x128xbf16>
    %c0_1 = arith.constant 0 : index
    %c0_2 = arith.constant 0 : index
    %1 = vector.load %arg9[%c0_1, %c0_2] : memref<1x128xf32, #tpu.memory_space<vmem>>, vector<1x128xf32>
    %c0_3 = arith.constant 0 : index
    %c0_4 = arith.constant 0 : index
    %2 = vector.load %arg10[%c0_3, %c0_4] : memref<128x128xbf16, #tpu.memory_space<vmem>>, vector<128x128xbf16>
    %c0_5 = arith.constant 0 : index
    %c0_6 = arith.constant 0 : index
    %3 = vector.load %arg11[%c0_5, %c0_6] : memref<1x128xf32, #tpu.memory_space<vmem>>, vector<1x128xf32>
    %c0_7 = arith.constant 0 : index
    %c0_8 = arith.constant 0 : index
    %4 = vector.load %arg4[%c0_7, %c0_8] : memref<2x128xf32, #tpu.memory_space<vmem>>, vector<2x128xf32>
    %5 = arith.mulf %4, %4 : vector<2x128xf32>
    %cst = arith.constant dense<0.000000e+00> : vector<2xf32>
    %6 = vector.multi_reduction <add>, %5, %cst [1] : vector<2x128xf32> to vector<2xf32>
    %7 = vector.shape_cast %6 : vector<2xf32> to vector<2x1xf32>
    %c0_9 = arith.constant 0 : index
    %c0_10 = arith.constant 0 : index
    %c0_11 = arith.constant 0 : index
    %8 = vector.load %arg1[%c0_9, %c0_10, %c0_11] : memref<2x8x32xbf16, #tpu.memory_space<vmem>>, vector<2x8x32xbf16>
    %9 = vector.shape_cast %8 : vector<2x8x32xbf16> to vector<16x32xbf16>
    %cst_12 = arith.constant dense<0.000000e+00> : vector<16x128xf32>
    %10 = tpu.matmul %9, %0, %cst_12 {dimension_numbers = #tpu.dot_dimension_numbers<[1], [0], [0], [1], [0, 0, 1, 1], [], []>} : vector<16x32xbf16>, vector<32x128xbf16>, vector<16x128xf32> -> vector<16x128xf32>
    %11 = vector.broadcast %1 : vector<1x128xf32> to vector<16x128xf32>
    %12 = arith.addf %10, %11 : vector<16x128xf32>
    %cst_13 = arith.constant 0.000000e+00 : f32
    %13 = vector.broadcast %cst_13 : f32 to vector<16x128xf32>
    %14 = arith.maximumf %12, %13 : vector<16x128xf32>
    %15 = arith.truncf %14 : vector<16x128xf32> to vector<16x128xbf16>
    %cst_14 = arith.constant dense<0.000000e+00> : vector<16x128xf32>
    %16 = tpu.matmul %15, %2, %cst_14 {dimension_numbers = #tpu.dot_dimension_numbers<[1], [0], [0], [1], [0, 0, 1, 1], [], []>} : vector<16x128xbf16>, vector<128x128xbf16>, vector<16x128xf32> -> vector<16x128xf32>
    %17 = vector.broadcast %3 : vector<1x128xf32> to vector<16x128xf32>
    %18 = arith.addf %16, %17 : vector<16x128xf32>
    %19 = vector.shape_cast %18 : vector<16x128xf32> to vector<2x8x128xf32>
    %20 = arith.mulf %19, %19 : vector<2x8x128xf32>
    %cst_15 = arith.constant dense<0.000000e+00> : vector<2x8xf32>
    %21 = vector.multi_reduction <add>, %20, %cst_15 [2] : vector<2x8x128xf32> to vector<2x8xf32>
    %22 = vector.shape_cast %4 : vector<2x128xf32> to vector<2x1x128xf32>
    %23 = vector.broadcast %22 : vector<2x1x128xf32> to vector<2x8x128xf32>
    %24 = arith.mulf %19, %23 : vector<2x8x128xf32>
    %cst_16 = arith.constant dense<0.000000e+00> : vector<2x8xf32>
    %25 = vector.multi_reduction <add>, %24, %cst_16 [2] : vector<2x8x128xf32> to vector<2x8xf32>
    %cst_17 = arith.constant 2.000000e+00 : f32
    %26 = vector.broadcast %cst_17 : f32 to vector<2x8xf32>
    %27 = arith.mulf %26, %25 : vector<2x8xf32>
    %28 = arith.subf %21, %27 : vector<2x8xf32>
    %29 = vector.broadcast %7 : vector<2x1xf32> to vector<2x8xf32>
    %30 = arith.addf %28, %29 : vector<2x8xf32>
    %c0_18 = arith.constant 0 : index
    %c0_19 = arith.constant 0 : index
    %31 = vector.load %arg5[%c0_18, %c0_19] : memref<2x8xf32, #tpu.memory_space<vmem>>, vector<2x8xf32>
    %cst_20 = arith.constant dense<0.000000e+00> : vector<2xf32>
    %32 = vector.multi_reduction <add>, %31, %cst_20 [1] : vector<2x8xf32> to vector<2xf32>
    %33 = vector.shape_cast %32 : vector<2xf32> to vector<2x1xf32>
    %cst_21 = arith.constant 1.000000e+00 : f32
    %34 = vector.broadcast %cst_21 : f32 to vector<2x1xf32>
    %35 = arith.maximumf %33, %34 : vector<2x1xf32>
    %36 = arith.mulf %30, %31 : vector<2x8xf32>
    %cst_22 = arith.constant dense<0.000000e+00> : vector<2xf32>
    %37 = vector.multi_reduction <add>, %36, %cst_22 [1] : vector<2x8xf32> to vector<2xf32>
    %38 = vector.shape_cast %37 : vector<2xf32> to vector<2x1xf32>
    %39 = arith.divf %38, %35 : vector<2x1xf32>
    %40 = vector.shape_cast %39 : vector<2x1xf32> to vector<2xf32>
    %c0_23 = arith.constant 0 : index
    %c0_24 = arith.constant 0 : index
    %c0_25 = arith.constant 0 : index
    %41 = vector.load %arg12[%c0_23, %c0_24, %c0_25] : memref<1x3x2xf32, #tpu.memory_space<vmem>>, vector<1x1x2xf32>
    %42 = vector.shape_cast %41 : vector<1x1x2xf32> to vector<2xf32>
    %43 = vector.shape_cast %40 : vector<2xf32> to vector<1x1x2xf32>
    tpu.vector_store %arg12[%c0_23, %c0_24, %c0_25], %43 {strides = array<i32>} : memref<1x3x2xf32, #tpu.memory_space<vmem>>, vector<1x1x2xf32>,
    %c0_26 = arith.constant 0 : index
    %c0_27 = arith.constant 0 : index
    %c0_28 = arith.constant 0 : index
    %44 = vector.load %arg2[%c0_26, %c0_27, %c0_28] : memref<2x8x32xbf16, #tpu.memory_space<vmem>>, vector<2x8x32xbf16>
    %45 = vector.shape_cast %44 : vector<2x8x32xbf16> to vector<16x32xbf16>
    %cst_29 = arith.constant dense<0.000000e+00> : vector<16x128xf32>
    %46 = tpu.matmul %45, %0, %cst_29 {dimension_numbers = #tpu.dot_dimension_numbers<[1], [0], [0], [1], [0, 0, 1, 1], [], []>} : vector<16x32xbf16>, vector<32x128xbf16>, vector<16x128xf32> -> vector<16x128xf32>
    %47 = vector.broadcast %1 : vector<1x128xf32> to vector<16x128xf32>
    %48 = arith.addf %46, %47 : vector<16x128xf32>
    %cst_30 = arith.constant 0.000000e+00 : f32
    %49 = vector.broadcast %cst_30 : f32 to vector<16x128xf32>
    %50 = arith.maximumf %48, %49 : vector<16x128xf32>
    %51 = arith.truncf %50 : vector<16x128xf32> to vector<16x128xbf16>
    %cst_31 = arith.constant dense<0.000000e+00> : vector<16x128xf32>
    %52 = tpu.matmul %51, %2, %cst_31 {dimension_numbers = #tpu.dot_dimension_numbers<[1], [0], [0], [1], [0, 0, 1, 1], [], []>} : vector<16x128xbf16>, vector<128x128xbf16>, vector<16x128xf32> -> vector<16x128xf32>
    %53 = vector.broadcast %3 : vector<1x128xf32> to vector<16x128xf32>
    %54 = arith.addf %52, %53 : vector<16x128xf32>
    %55 = vector.shape_cast %54 : vector<16x128xf32> to vector<2x8x128xf32>
    %56 = arith.mulf %55, %55 : vector<2x8x128xf32>
    %cst_32 = arith.constant dense<0.000000e+00> : vector<2x8xf32>
    %57 = vector.multi_reduction <add>, %56, %cst_32 [2] : vector<2x8x128xf32> to vector<2x8xf32>
    %58 = vector.shape_cast %4 : vector<2x128xf32> to vector<2x1x128xf32>
    %59 = vector.broadcast %58 : vector<2x1x128xf32> to vector<2x8x128xf32>
    %60 = arith.mulf %55, %59 : vector<2x8x128xf32>
    %cst_33 = arith.constant dense<0.000000e+00> : vector<2x8xf32>
    %61 = vector.multi_reduction <add>, %60, %cst_33 [2] : vector<2x8x128xf32> to vector<2x8xf32>
    %cst_34 = arith.constant 2.000000e+00 : f32
    %62 = vector.broadcast %cst_34 : f32 to vector<2x8xf32>
    %63 = arith.mulf %62, %61 : vector<2x8xf32>
    %64 = arith.subf %57, %63 : vector<2x8xf32>
    %65 = vector.broadcast %7 : vector<2x1xf32> to vector<2x8xf32>
    %66 = arith.addf %64, %65 : vector<2x8xf32>
    %c0_35 = arith.constant 0 : index
    %c0_36 = arith.constant 0 : index
    %67 = vector.load %arg6[%c0_35, %c0_36] : memref<2x8xf32, #tpu.memory_space<vmem>>, vector<2x8xf32>
    %cst_37 = arith.constant dense<0.000000e+00> : vector<2xf32>
    %68 = vector.multi_reduction <add>, %67, %cst_37 [1] : vector<2x8xf32> to vector<2xf32>
    %69 = vector.shape_cast %68 : vector<2xf32> to vector<2x1xf32>
    %cst_38 = arith.constant 1.000000e+00 : f32
    %70 = vector.broadcast %cst_38 : f32 to vector<2x1xf32>
    %71 = arith.maximumf %69, %70 : vector<2x1xf32>
    %72 = arith.mulf %66, %67 : vector<2x8xf32>
    %cst_39 = arith.constant dense<0.000000e+00> : vector<2xf32>
    %73 = vector.multi_reduction <add>, %72, %cst_39 [1] : vector<2x8xf32> to vector<2xf32>
    %74 = vector.shape_cast %73 : vector<2xf32> to vector<2x1xf32>
    %75 = arith.divf %74, %71 : vector<2x1xf32>
    %76 = vector.shape_cast %75 : vector<2x1xf32> to vector<2xf32>
    %c0_40 = arith.constant 0 : index
    %c1 = arith.constant 1 : index
    %c0_41 = arith.constant 0 : index
    %77 = vector.load %arg12[%c0_40, %c1, %c0_41] : memref<1x3x2xf32, #tpu.memory_space<vmem>>, vector<1x1x2xf32>
    %78 = vector.shape_cast %77 : vector<1x1x2xf32> to vector<2xf32>
    %79 = vector.shape_cast %76 : vector<2xf32> to vector<1x1x2xf32>
    tpu.vector_store %arg12[%c0_40, %c1, %c0_41], %79 {strides = array<i32>} : memref<1x3x2xf32, #tpu.memory_space<vmem>>, vector<1x1x2xf32>,
    %c0_42 = arith.constant 0 : index
    %c0_43 = arith.constant 0 : index
    %c0_44 = arith.constant 0 : index
    %80 = vector.load %arg3[%c0_42, %c0_43, %c0_44] : memref<2x8x32xbf16, #tpu.memory_space<vmem>>, vector<2x8x32xbf16>
    %81 = vector.shape_cast %80 : vector<2x8x32xbf16> to vector<16x32xbf16>
    %cst_45 = arith.constant dense<0.000000e+00> : vector<16x128xf32>
    %82 = tpu.matmul %81, %0, %cst_45 {dimension_numbers = #tpu.dot_dimension_numbers<[1], [0], [0], [1], [0, 0, 1, 1], [], []>} : vector<16x32xbf16>, vector<32x128xbf16>, vector<16x128xf32> -> vector<16x128xf32>
    %83 = vector.broadcast %1 : vector<1x128xf32> to vector<16x128xf32>
    %84 = arith.addf %82, %83 : vector<16x128xf32>
    %cst_46 = arith.constant 0.000000e+00 : f32
    %85 = vector.broadcast %cst_46 : f32 to vector<16x128xf32>
    %86 = arith.maximumf %84, %85 : vector<16x128xf32>
    %87 = arith.truncf %86 : vector<16x128xf32> to vector<16x128xbf16>
    %cst_47 = arith.constant dense<0.000000e+00> : vector<16x128xf32>
    %88 = tpu.matmul %87, %2, %cst_47 {dimension_numbers = #tpu.dot_dimension_numbers<[1], [0], [0], [1], [0, 0, 1, 1], [], []>} : vector<16x128xbf16>, vector<128x128xbf16>, vector<16x128xf32> -> vector<16x128xf32>
    %89 = vector.broadcast %3 : vector<1x128xf32> to vector<16x128xf32>
    %90 = arith.addf %88, %89 : vector<16x128xf32>
    %91 = vector.shape_cast %90 : vector<16x128xf32> to vector<2x8x128xf32>
    %92 = arith.mulf %91, %91 : vector<2x8x128xf32>
    %cst_48 = arith.constant dense<0.000000e+00> : vector<2x8xf32>
    %93 = vector.multi_reduction <add>, %92, %cst_48 [2] : vector<2x8x128xf32> to vector<2x8xf32>
    %94 = vector.shape_cast %4 : vector<2x128xf32> to vector<2x1x128xf32>
    %95 = vector.broadcast %94 : vector<2x1x128xf32> to vector<2x8x128xf32>
    %96 = arith.mulf %91, %95 : vector<2x8x128xf32>
    %cst_49 = arith.constant dense<0.000000e+00> : vector<2x8xf32>
    %97 = vector.multi_reduction <add>, %96, %cst_49 [2] : vector<2x8x128xf32> to vector<2x8xf32>
    %cst_50 = arith.constant 2.000000e+00 : f32
    %98 = vector.broadcast %cst_50 : f32 to vector<2x8xf32>
    %99 = arith.mulf %98, %97 : vector<2x8xf32>
    %100 = arith.subf %93, %99 : vector<2x8xf32>
    %101 = vector.broadcast %7 : vector<2x1xf32> to vector<2x8xf32>
    %102 = arith.addf %100, %101 : vector<2x8xf32>
    %c0_51 = arith.constant 0 : index
    %c0_52 = arith.constant 0 : index
    %103 = vector.load %arg7[%c0_51, %c0_52] : memref<2x8xf32, #tpu.memory_space<vmem>>, vector<2x8xf32>
    %cst_53 = arith.constant dense<0.000000e+00> : vector<2xf32>
    %104 = vector.multi_reduction <add>, %103, %cst_53 [1] : vector<2x8xf32> to vector<2xf32>
    %105 = vector.shape_cast %104 : vector<2xf32> to vector<2x1xf32>
    %cst_54 = arith.constant 1.000000e+00 : f32
    %106 = vector.broadcast %cst_54 : f32 to vector<2x1xf32>
    %107 = arith.maximumf %105, %106 : vector<2x1xf32>
    %108 = arith.mulf %102, %103 : vector<2x8xf32>
    %cst_55 = arith.constant dense<0.000000e+00> : vector<2xf32>
    %109 = vector.multi_reduction <add>, %108, %cst_55 [1] : vector<2x8xf32> to vector<2xf32>
    %110 = vector.shape_cast %109 : vector<2xf32> to vector<2x1xf32>
    %111 = arith.divf %110, %107 : vector<2x1xf32>
    %112 = vector.shape_cast %111 : vector<2x1xf32> to vector<2xf32>
    %c0_56 = arith.constant 0 : index
    %c2 = arith.constant 2 : index
    %c0_57 = arith.constant 0 : index
    %113 = vector.load %arg12[%c0_56, %c2, %c0_57] : memref<1x3x2xf32, #tpu.memory_space<vmem>>, vector<1x1x2xf32>
    %114 = vector.shape_cast %113 : vector<1x1x2xf32> to vector<2xf32>
    %115 = vector.shape_cast %112 : vector<2xf32> to vector<1x1x2xf32>
    tpu.vector_store %arg12[%c0_56, %c2, %c0_57], %115 {strides = array<i32>} : memref<1x3x2xf32, #tpu.memory_space<vmem>>, vector<1x1x2xf32>,
    return
  }
  func.func @transform_0(%arg0: i32) -> (i32, i32, i32) {
    %c0_i32 = arith.constant 0 : i32
    %c0_i32_0 = arith.constant 0 : i32
    %c0_i32_1 = arith.constant 0 : i32
    return %arg0, %c0_i32, %c0_i32_0 : i32, i32, i32
  }
  func.func @transform_1(%arg0: i32) -> (i32, i32, i32) {
    %c0_i32 = arith.constant 0 : i32
    %c0_i32_0 = arith.constant 0 : i32
    %c0_i32_1 = arith.constant 0 : i32
    return %arg0, %c0_i32, %c0_i32_0 : i32, i32, i32
  }
  func.func @transform_2(%arg0: i32) -> (i32, i32, i32) {
    %c0_i32 = arith.constant 0 : i32
    %c0_i32_0 = arith.constant 0 : i32
    %c0_i32_1 = arith.constant 0 : i32
    return %arg0, %c0_i32, %c0_i32_0 : i32, i32, i32
  }
  func.func @transform_3(%arg0: i32) -> (i32, i32) {
    %c0_i32 = arith.constant 0 : i32
    %c0_i32_0 = arith.constant 0 : i32
    return %arg0, %c0_i32 : i32, i32
  }
  func.func @transform_4(%arg0: i32) -> (i32, i32) {
    %c0_i32 = arith.constant 0 : i32
    %c0_i32_0 = arith.constant 0 : i32
    return %arg0, %c0_i32 : i32, i32
  }
  func.func @transform_5(%arg0: i32) -> (i32, i32) {
    %c0_i32 = arith.constant 0 : i32
    %c0_i32_0 = arith.constant 0 : i32
    return %arg0, %c0_i32 : i32, i32
  }
  func.func @transform_6(%arg0: i32) -> (i32, i32) {
    %c0_i32 = arith.constant 0 : i32
    %c0_i32_0 = arith.constant 0 : i32
    return %arg0, %c0_i32 : i32, i32
  }
  func.func @transform_7(%arg0: i32) -> (i32, i32) {
    %c0_i32 = arith.constant 0 : i32
    %c0_i32_0 = arith.constant 0 : i32
    %c0_i32_1 = arith.constant 0 : i32
    return %c0_i32, %c0_i32_0 : i32, i32
  }
  func.func @transform_8(%arg0: i32) -> (i32, i32) {
    %c0_i32 = arith.constant 0 : i32
    %c0_i32_0 = arith.constant 0 : i32
    %c0_i32_1 = arith.constant 0 : i32
    return %c0_i32, %c0_i32_0 : i32, i32
  }
  func.func @transform_9(%arg0: i32) -> (i32, i32) {
    %c0_i32 = arith.constant 0 : i32
    %c0_i32_0 = arith.constant 0 : i32
    %c0_i32_1 = arith.constant 0 : i32
    return %c0_i32, %c0_i32_0 : i32, i32
  }
  func.func @transform_10(%arg0: i32) -> (i32, i32) {
    %c0_i32 = arith.constant 0 : i32
    %c0_i32_0 = arith.constant 0 : i32
    %c0_i32_1 = arith.constant 0 : i32
    return %c0_i32, %c0_i32_0 : i32, i32
  }
  func.func @transform_11(%arg0: i32) -> (i32, i32, i32) {
    %c0_i32 = arith.constant 0 : i32
    %c0_i32_0 = arith.constant 0 : i32
    %c0_i32_1 = arith.constant 0 : i32
    return %arg0, %c0_i32, %c0_i32_0 : i32, i32, i32
  }
}

module attributes {stable_mosaic.version = 11 : i64} {
  func.func @kernel(%arg0: i32, %arg1: memref<8x2x16xf32, #tpu.memory_space<vmem>>, %arg2: memref<2x1xi32, #tpu.memory_space<vmem>>, %arg3: memref<16x512xbf16, #tpu.memory_space<vmem>>, %arg4: memref<128x512xbf16, #tpu.memory_space<vmem>>, %arg5: memref<1x512xf32, #tpu.memory_space<vmem>>, %arg6: memref<128x128xbf16, #tpu.memory_space<vmem>>, %arg7: memref<1x128xf32, #tpu.memory_space<vmem>>, %arg8: memref<2x128xf32, #tpu.memory_space<vmem>>, %arg9: memref<8x2x512xbf16, #tpu.memory_space<vmem>>) attributes {dimension_semantics = [#tpu.dimension_semantics<parallel>], iteration_bounds = array<i64: 1>, scalar_prefetch = 0 : i64, scratch_operands = 1 : i64, tpu.core_type = #tpu.core_type<tc>, window_params = [{transform_indices = @transform_0, window_bounds = array<i64: 8, 2, 16>}, {transform_indices = @transform_1, window_bounds = array<i64: 2, 1>}, {pipeline_mode = #tpu.pipeline_mode<synchronous>, transform_indices = @transform_2, window_bounds = array<i64: 16, 512>}, {pipeline_mode = #tpu.pipeline_mode<synchronous>, transform_indices = @transform_3, window_bounds = array<i64: 128, 512>}, {pipeline_mode = #tpu.pipeline_mode<synchronous>, transform_indices = @transform_4, window_bounds = array<i64: 1, 512>}, {pipeline_mode = #tpu.pipeline_mode<synchronous>, transform_indices = @transform_5, window_bounds = array<i64: 128, 128>}, {pipeline_mode = #tpu.pipeline_mode<synchronous>, transform_indices = @transform_6, window_bounds = array<i64: 1, 128>}, {transform_indices = @transform_7, window_bounds = array<i64: 2, 128>}]} {
    %c0 = arith.constant 0 : index
    %c0_0 = arith.constant 0 : index
    %c0_1 = arith.constant 0 : index
    %0 = vector.load %arg1[%c0, %c0_0, %c0_1] : memref<8x2x16xf32, #tpu.memory_space<vmem>>, vector<8x2x16xf32>
    %1 = vector.shape_cast %0 : vector<8x2x16xf32> to vector<16x16xf32>
    %2 = arith.truncf %1 : vector<16x16xf32> to vector<16x16xbf16>
    %c0_2 = arith.constant 0 : index
    %c0_3 = arith.constant 0 : index
    %3 = vector.load %arg3[%c0_2, %c0_3] : memref<16x512xbf16, #tpu.memory_space<vmem>>, vector<16x512xbf16>
    %cst = arith.constant dense<0.000000e+00> : vector<16x512xf32>
    %4 = tpu.matmul %2, %3, %cst {dimension_numbers = #tpu.dot_dimension_numbers<[1], [0], [0], [1], [0, 0, 1, 1], [], []>} : vector<16x16xbf16>, vector<16x512xbf16>, vector<16x512xf32> -> vector<16x512xf32>
    %c0_4 = arith.constant 0 : index
    %c0_5 = arith.constant 0 : index
    %5 = vector.load %arg5[%c0_4, %c0_5] : memref<1x512xf32, #tpu.memory_space<vmem>>, vector<1x512xf32>
    %6 = vector.broadcast %5 : vector<1x512xf32> to vector<16x512xf32>
    %7 = arith.addf %4, %6 : vector<16x512xf32>
    %8 = vector.shape_cast %7 : vector<16x512xf32> to vector<8x2x512xf32>
    %9 = arith.truncf %8 : vector<8x2x512xf32> to vector<8x2x512xbf16>
    %c0_6 = arith.constant 0 : index
    %c0_7 = arith.constant 0 : index
    %c0_8 = arith.constant 0 : index
    %10 = vector.load %arg9[%c0_6, %c0_7, %c0_8] : memref<8x2x512xbf16, #tpu.memory_space<vmem>>, vector<8x2x512xbf16>
    tpu.vector_store %arg9[%c0_6, %c0_7, %c0_8], %9 {strides = array<i32>} : memref<8x2x512xbf16, #tpu.memory_space<vmem>>, vector<8x2x512xbf16>,
    %c0_9 = arith.constant 0 : index
    %c0_10 = arith.constant 0 : index
    %11 = vector.load %arg4[%c0_9, %c0_10] : memref<128x512xbf16, #tpu.memory_space<vmem>>, vector<128x512xbf16>
    %c0_11 = arith.constant 0 : index
    %c0_12 = arith.constant 0 : index
    %12 = vector.load %arg2[%c0_11, %c0_12] : memref<2x1xi32, #tpu.memory_space<vmem>>, vector<2x1xi32>
    %13 = vector.shape_cast %12 : vector<2x1xi32> to vector<2x1xi32>
    %14 = vector.broadcast %13 : vector<2x1xi32> to vector<2x128xi32>
    %cst_13 = arith.constant 0.000000e+00 : f32
    %15 = vector.broadcast %cst_13 : f32 to vector<2x128xf32>
    %c0_i32 = arith.constant 0 : i32
    %16 = arith.index_cast %c0_i32 : i32 to index
    %c0_14 = arith.constant 0 : index
    %c0_15 = arith.constant 0 : index
    %17 = vector.load %arg9[%16, %c0_14, %c0_15] : memref<8x2x512xbf16, #tpu.memory_space<vmem>>, vector<1x2x512xbf16>
    %18 = vector.shape_cast %17 : vector<1x2x512xbf16> to vector<2x512xbf16>
    %19 = arith.extf %18 : vector<2x512xbf16> to vector<2x512xf32>
    %20 = arith.truncf %15 : vector<2x128xf32> to vector<2x128xbf16>
    %cst_16 = arith.constant dense<0.000000e+00> : vector<2x512xf32>
    %21 = tpu.matmul %20, %11, %cst_16 {dimension_numbers = #tpu.dot_dimension_numbers<[1], [0], [0], [1], [0, 0, 1, 1], [], []>} : vector<2x128xbf16>, vector<128x512xbf16>, vector<2x512xf32> -> vector<2x512xf32>
    %22 = arith.addf %19, %21 : vector<2x512xf32>
    %23 = vector.extract_strided_slice %22 {offsets = [0, 0], sizes = [2, 128], strides = [1, 1]} : vector<2x512xf32> to vector<2x128xf32>
    %24 = arith.negf %23 : vector<2x128xf32>
    %25 = math.exp %24 : vector<2x128xf32>
    %cst_17 = arith.constant 1.000000e+00 : f32
    %26 = vector.broadcast %cst_17 : f32 to vector<2x128xf32>
    %27 = arith.addf %26, %25 : vector<2x128xf32>
    %28 = arith.divf %26, %27 : vector<2x128xf32>
    %29 = vector.extract_strided_slice %22 {offsets = [0, 128], sizes = [2, 128], strides = [1, 1]} : vector<2x512xf32> to vector<2x128xf32>
    %30 = arith.negf %29 : vector<2x128xf32>
    %31 = math.exp %30 : vector<2x128xf32>
    %cst_18 = arith.constant 1.000000e+00 : f32
    %32 = vector.broadcast %cst_18 : f32 to vector<2x128xf32>
    %33 = arith.addf %32, %31 : vector<2x128xf32>
    %34 = arith.divf %32, %33 : vector<2x128xf32>
    %35 = vector.extract_strided_slice %22 {offsets = [0, 256], sizes = [2, 128], strides = [1, 1]} : vector<2x512xf32> to vector<2x128xf32>
    %36 = math.tanh %35 : vector<2x128xf32>
    %37 = vector.extract_strided_slice %22 {offsets = [0, 384], sizes = [2, 128], strides = [1, 1]} : vector<2x512xf32> to vector<2x128xf32>
    %38 = arith.negf %37 : vector<2x128xf32>
    %39 = math.exp %38 : vector<2x128xf32>
    %cst_19 = arith.constant 1.000000e+00 : f32
    %40 = vector.broadcast %cst_19 : f32 to vector<2x128xf32>
    %41 = arith.addf %40, %39 : vector<2x128xf32>
    %42 = arith.divf %40, %41 : vector<2x128xf32>
    %43 = arith.mulf %34, %15 : vector<2x128xf32>
    %44 = arith.mulf %28, %36 : vector<2x128xf32>
    %45 = arith.addf %43, %44 : vector<2x128xf32>
    %46 = math.tanh %45 : vector<2x128xf32>
    %47 = arith.mulf %42, %46 : vector<2x128xf32>
    %c1_i32 = arith.constant 1 : i32
    %48 = arith.addi %c0_i32, %c1_i32 : i32
    %49 = vector.broadcast %48 : i32 to vector<2x128xi32>
    %50 = arith.cmpi eq, %14, %49 : vector<2x128xi32>
    %51 = arith.select %50, %47, %15 : vector<2x128xi1>, vector<2x128xf32>
    %c1_i32_20 = arith.constant 1 : i32
    %52 = arith.index_cast %c1_i32_20 : i32 to index
    %c0_21 = arith.constant 0 : index
    %c0_22 = arith.constant 0 : index
    %53 = vector.load %arg9[%52, %c0_21, %c0_22] : memref<8x2x512xbf16, #tpu.memory_space<vmem>>, vector<1x2x512xbf16>
    %54 = vector.shape_cast %53 : vector<1x2x512xbf16> to vector<2x512xbf16>
    %55 = arith.extf %54 : vector<2x512xbf16> to vector<2x512xf32>
    %56 = arith.truncf %47 : vector<2x128xf32> to vector<2x128xbf16>
    %cst_23 = arith.constant dense<0.000000e+00> : vector<2x512xf32>
    %57 = tpu.matmul %56, %11, %cst_23 {dimension_numbers = #tpu.dot_dimension_numbers<[1], [0], [0], [1], [0, 0, 1, 1], [], []>} : vector<2x128xbf16>, vector<128x512xbf16>, vector<2x512xf32> -> vector<2x512xf32>
    %58 = arith.addf %55, %57 : vector<2x512xf32>
    %59 = vector.extract_strided_slice %58 {offsets = [0, 0], sizes = [2, 128], strides = [1, 1]} : vector<2x512xf32> to vector<2x128xf32>
    %60 = arith.negf %59 : vector<2x128xf32>
    %61 = math.exp %60 : vector<2x128xf32>
    %cst_24 = arith.constant 1.000000e+00 : f32
    %62 = vector.broadcast %cst_24 : f32 to vector<2x128xf32>
    %63 = arith.addf %62, %61 : vector<2x128xf32>
    %64 = arith.divf %62, %63 : vector<2x128xf32>
    %65 = vector.extract_strided_slice %58 {offsets = [0, 128], sizes = [2, 128], strides = [1, 1]} : vector<2x512xf32> to vector<2x128xf32>
    %66 = arith.negf %65 : vector<2x128xf32>
    %67 = math.exp %66 : vector<2x128xf32>
    %cst_25 = arith.constant 1.000000e+00 : f32
    %68 = vector.broadcast %cst_25 : f32 to vector<2x128xf32>
    %69 = arith.addf %68, %67 : vector<2x128xf32>
    %70 = arith.divf %68, %69 : vector<2x128xf32>
    %71 = vector.extract_strided_slice %58 {offsets = [0, 256], sizes = [2, 128], strides = [1, 1]} : vector<2x512xf32> to vector<2x128xf32>
    %72 = math.tanh %71 : vector<2x128xf32>
    %73 = vector.extract_strided_slice %58 {offsets = [0, 384], sizes = [2, 128], strides = [1, 1]} : vector<2x512xf32> to vector<2x128xf32>
    %74 = arith.negf %73 : vector<2x128xf32>
    %75 = math.exp %74 : vector<2x128xf32>
    %cst_26 = arith.constant 1.000000e+00 : f32
    %76 = vector.broadcast %cst_26 : f32 to vector<2x128xf32>
    %77 = arith.addf %76, %75 : vector<2x128xf32>
    %78 = arith.divf %76, %77 : vector<2x128xf32>
    %79 = arith.mulf %70, %45 : vector<2x128xf32>
    %80 = arith.mulf %64, %72 : vector<2x128xf32>
    %81 = arith.addf %79, %80 : vector<2x128xf32>
    %82 = math.tanh %81 : vector<2x128xf32>
    %83 = arith.mulf %78, %82 : vector<2x128xf32>
    %c1_i32_27 = arith.constant 1 : i32
    %84 = arith.addi %c1_i32_20, %c1_i32_27 : i32
    %85 = vector.broadcast %84 : i32 to vector<2x128xi32>
    %86 = arith.cmpi eq, %14, %85 : vector<2x128xi32>
    %87 = arith.select %86, %83, %51 : vector<2x128xi1>, vector<2x128xf32>
    %c2_i32 = arith.constant 2 : i32
    %88 = arith.index_cast %c2_i32 : i32 to index
    %c0_28 = arith.constant 0 : index
    %c0_29 = arith.constant 0 : index
    %89 = vector.load %arg9[%88, %c0_28, %c0_29] : memref<8x2x512xbf16, #tpu.memory_space<vmem>>, vector<1x2x512xbf16>
    %90 = vector.shape_cast %89 : vector<1x2x512xbf16> to vector<2x512xbf16>
    %91 = arith.extf %90 : vector<2x512xbf16> to vector<2x512xf32>
    %92 = arith.truncf %83 : vector<2x128xf32> to vector<2x128xbf16>
    %cst_30 = arith.constant dense<0.000000e+00> : vector<2x512xf32>
    %93 = tpu.matmul %92, %11, %cst_30 {dimension_numbers = #tpu.dot_dimension_numbers<[1], [0], [0], [1], [0, 0, 1, 1], [], []>} : vector<2x128xbf16>, vector<128x512xbf16>, vector<2x512xf32> -> vector<2x512xf32>
    %94 = arith.addf %91, %93 : vector<2x512xf32>
    %95 = vector.extract_strided_slice %94 {offsets = [0, 0], sizes = [2, 128], strides = [1, 1]} : vector<2x512xf32> to vector<2x128xf32>
    %96 = arith.negf %95 : vector<2x128xf32>
    %97 = math.exp %96 : vector<2x128xf32>
    %cst_31 = arith.constant 1.000000e+00 : f32
    %98 = vector.broadcast %cst_31 : f32 to vector<2x128xf32>
    %99 = arith.addf %98, %97 : vector<2x128xf32>
    %100 = arith.divf %98, %99 : vector<2x128xf32>
    %101 = vector.extract_strided_slice %94 {offsets = [0, 128], sizes = [2, 128], strides = [1, 1]} : vector<2x512xf32> to vector<2x128xf32>
    %102 = arith.negf %101 : vector<2x128xf32>
    %103 = math.exp %102 : vector<2x128xf32>
    %cst_32 = arith.constant 1.000000e+00 : f32
    %104 = vector.broadcast %cst_32 : f32 to vector<2x128xf32>
    %105 = arith.addf %104, %103 : vector<2x128xf32>
    %106 = arith.divf %104, %105 : vector<2x128xf32>
    %107 = vector.extract_strided_slice %94 {offsets = [0, 256], sizes = [2, 128], strides = [1, 1]} : vector<2x512xf32> to vector<2x128xf32>
    %108 = math.tanh %107 : vector<2x128xf32>
    %109 = vector.extract_strided_slice %94 {offsets = [0, 384], sizes = [2, 128], strides = [1, 1]} : vector<2x512xf32> to vector<2x128xf32>
    %110 = arith.negf %109 : vector<2x128xf32>
    %111 = math.exp %110 : vector<2x128xf32>
    %cst_33 = arith.constant 1.000000e+00 : f32
    %112 = vector.broadcast %cst_33 : f32 to vector<2x128xf32>
    %113 = arith.addf %112, %111 : vector<2x128xf32>
    %114 = arith.divf %112, %113 : vector<2x128xf32>
    %115 = arith.mulf %106, %81 : vector<2x128xf32>
    %116 = arith.mulf %100, %108 : vector<2x128xf32>
    %117 = arith.addf %115, %116 : vector<2x128xf32>
    %118 = math.tanh %117 : vector<2x128xf32>
    %119 = arith.mulf %114, %118 : vector<2x128xf32>
    %c1_i32_34 = arith.constant 1 : i32
    %120 = arith.addi %c2_i32, %c1_i32_34 : i32
    %121 = vector.broadcast %120 : i32 to vector<2x128xi32>
    %122 = arith.cmpi eq, %14, %121 : vector<2x128xi32>
    %123 = arith.select %122, %119, %87 : vector<2x128xi1>, vector<2x128xf32>
    %c3_i32 = arith.constant 3 : i32
    %124 = arith.index_cast %c3_i32 : i32 to index
    %c0_35 = arith.constant 0 : index
    %c0_36 = arith.constant 0 : index
    %125 = vector.load %arg9[%124, %c0_35, %c0_36] : memref<8x2x512xbf16, #tpu.memory_space<vmem>>, vector<1x2x512xbf16>
    %126 = vector.shape_cast %125 : vector<1x2x512xbf16> to vector<2x512xbf16>
    %127 = arith.extf %126 : vector<2x512xbf16> to vector<2x512xf32>
    %128 = arith.truncf %119 : vector<2x128xf32> to vector<2x128xbf16>
    %cst_37 = arith.constant dense<0.000000e+00> : vector<2x512xf32>
    %129 = tpu.matmul %128, %11, %cst_37 {dimension_numbers = #tpu.dot_dimension_numbers<[1], [0], [0], [1], [0, 0, 1, 1], [], []>} : vector<2x128xbf16>, vector<128x512xbf16>, vector<2x512xf32> -> vector<2x512xf32>
    %130 = arith.addf %127, %129 : vector<2x512xf32>
    %131 = vector.extract_strided_slice %130 {offsets = [0, 0], sizes = [2, 128], strides = [1, 1]} : vector<2x512xf32> to vector<2x128xf32>
    %132 = arith.negf %131 : vector<2x128xf32>
    %133 = math.exp %132 : vector<2x128xf32>
    %cst_38 = arith.constant 1.000000e+00 : f32
    %134 = vector.broadcast %cst_38 : f32 to vector<2x128xf32>
    %135 = arith.addf %134, %133 : vector<2x128xf32>
    %136 = arith.divf %134, %135 : vector<2x128xf32>
    %137 = vector.extract_strided_slice %130 {offsets = [0, 128], sizes = [2, 128], strides = [1, 1]} : vector<2x512xf32> to vector<2x128xf32>
    %138 = arith.negf %137 : vector<2x128xf32>
    %139 = math.exp %138 : vector<2x128xf32>
    %cst_39 = arith.constant 1.000000e+00 : f32
    %140 = vector.broadcast %cst_39 : f32 to vector<2x128xf32>
    %141 = arith.addf %140, %139 : vector<2x128xf32>
    %142 = arith.divf %140, %141 : vector<2x128xf32>
    %143 = vector.extract_strided_slice %130 {offsets = [0, 256], sizes = [2, 128], strides = [1, 1]} : vector<2x512xf32> to vector<2x128xf32>
    %144 = math.tanh %143 : vector<2x128xf32>
    %145 = vector.extract_strided_slice %130 {offsets = [0, 384], sizes = [2, 128], strides = [1, 1]} : vector<2x512xf32> to vector<2x128xf32>
    %146 = arith.negf %145 : vector<2x128xf32>
    %147 = math.exp %146 : vector<2x128xf32>
    %cst_40 = arith.constant 1.000000e+00 : f32
    %148 = vector.broadcast %cst_40 : f32 to vector<2x128xf32>
    %149 = arith.addf %148, %147 : vector<2x128xf32>
    %150 = arith.divf %148, %149 : vector<2x128xf32>
    %151 = arith.mulf %142, %117 : vector<2x128xf32>
    %152 = arith.mulf %136, %144 : vector<2x128xf32>
    %153 = arith.addf %151, %152 : vector<2x128xf32>
    %154 = math.tanh %153 : vector<2x128xf32>
    %155 = arith.mulf %150, %154 : vector<2x128xf32>
    %c1_i32_41 = arith.constant 1 : i32
    %156 = arith.addi %c3_i32, %c1_i32_41 : i32
    %157 = vector.broadcast %156 : i32 to vector<2x128xi32>
    %158 = arith.cmpi eq, %14, %157 : vector<2x128xi32>
    %159 = arith.select %158, %155, %123 : vector<2x128xi1>, vector<2x128xf32>
    %c4_i32 = arith.constant 4 : i32
    %160 = arith.index_cast %c4_i32 : i32 to index
    %c0_42 = arith.constant 0 : index
    %c0_43 = arith.constant 0 : index
    %161 = vector.load %arg9[%160, %c0_42, %c0_43] : memref<8x2x512xbf16, #tpu.memory_space<vmem>>, vector<1x2x512xbf16>
    %162 = vector.shape_cast %161 : vector<1x2x512xbf16> to vector<2x512xbf16>
    %163 = arith.extf %162 : vector<2x512xbf16> to vector<2x512xf32>
    %164 = arith.truncf %155 : vector<2x128xf32> to vector<2x128xbf16>
    %cst_44 = arith.constant dense<0.000000e+00> : vector<2x512xf32>
    %165 = tpu.matmul %164, %11, %cst_44 {dimension_numbers = #tpu.dot_dimension_numbers<[1], [0], [0], [1], [0, 0, 1, 1], [], []>} : vector<2x128xbf16>, vector<128x512xbf16>, vector<2x512xf32> -> vector<2x512xf32>
    %166 = arith.addf %163, %165 : vector<2x512xf32>
    %167 = vector.extract_strided_slice %166 {offsets = [0, 0], sizes = [2, 128], strides = [1, 1]} : vector<2x512xf32> to vector<2x128xf32>
    %168 = arith.negf %167 : vector<2x128xf32>
    %169 = math.exp %168 : vector<2x128xf32>
    %cst_45 = arith.constant 1.000000e+00 : f32
    %170 = vector.broadcast %cst_45 : f32 to vector<2x128xf32>
    %171 = arith.addf %170, %169 : vector<2x128xf32>
    %172 = arith.divf %170, %171 : vector<2x128xf32>
    %173 = vector.extract_strided_slice %166 {offsets = [0, 128], sizes = [2, 128], strides = [1, 1]} : vector<2x512xf32> to vector<2x128xf32>
    %174 = arith.negf %173 : vector<2x128xf32>
    %175 = math.exp %174 : vector<2x128xf32>
    %cst_46 = arith.constant 1.000000e+00 : f32
    %176 = vector.broadcast %cst_46 : f32 to vector<2x128xf32>
    %177 = arith.addf %176, %175 : vector<2x128xf32>
    %178 = arith.divf %176, %177 : vector<2x128xf32>
    %179 = vector.extract_strided_slice %166 {offsets = [0, 256], sizes = [2, 128], strides = [1, 1]} : vector<2x512xf32> to vector<2x128xf32>
    %180 = math.tanh %179 : vector<2x128xf32>
    %181 = vector.extract_strided_slice %166 {offsets = [0, 384], sizes = [2, 128], strides = [1, 1]} : vector<2x512xf32> to vector<2x128xf32>
    %182 = arith.negf %181 : vector<2x128xf32>
    %183 = math.exp %182 : vector<2x128xf32>
    %cst_47 = arith.constant 1.000000e+00 : f32
    %184 = vector.broadcast %cst_47 : f32 to vector<2x128xf32>
    %185 = arith.addf %184, %183 : vector<2x128xf32>
    %186 = arith.divf %184, %185 : vector<2x128xf32>
    %187 = arith.mulf %178, %153 : vector<2x128xf32>
    %188 = arith.mulf %172, %180 : vector<2x128xf32>
    %189 = arith.addf %187, %188 : vector<2x128xf32>
    %190 = math.tanh %189 : vector<2x128xf32>
    %191 = arith.mulf %186, %190 : vector<2x128xf32>
    %c1_i32_48 = arith.constant 1 : i32
    %192 = arith.addi %c4_i32, %c1_i32_48 : i32
    %193 = vector.broadcast %192 : i32 to vector<2x128xi32>
    %194 = arith.cmpi eq, %14, %193 : vector<2x128xi32>
    %195 = arith.select %194, %191, %159 : vector<2x128xi1>, vector<2x128xf32>
    %c5_i32 = arith.constant 5 : i32
    %196 = arith.index_cast %c5_i32 : i32 to index
    %c0_49 = arith.constant 0 : index
    %c0_50 = arith.constant 0 : index
    %197 = vector.load %arg9[%196, %c0_49, %c0_50] : memref<8x2x512xbf16, #tpu.memory_space<vmem>>, vector<1x2x512xbf16>
    %198 = vector.shape_cast %197 : vector<1x2x512xbf16> to vector<2x512xbf16>
    %199 = arith.extf %198 : vector<2x512xbf16> to vector<2x512xf32>
    %200 = arith.truncf %191 : vector<2x128xf32> to vector<2x128xbf16>
    %cst_51 = arith.constant dense<0.000000e+00> : vector<2x512xf32>
    %201 = tpu.matmul %200, %11, %cst_51 {dimension_numbers = #tpu.dot_dimension_numbers<[1], [0], [0], [1], [0, 0, 1, 1], [], []>} : vector<2x128xbf16>, vector<128x512xbf16>, vector<2x512xf32> -> vector<2x512xf32>
    %202 = arith.addf %199, %201 : vector<2x512xf32>
    %203 = vector.extract_strided_slice %202 {offsets = [0, 0], sizes = [2, 128], strides = [1, 1]} : vector<2x512xf32> to vector<2x128xf32>
    %204 = arith.negf %203 : vector<2x128xf32>
    %205 = math.exp %204 : vector<2x128xf32>
    %cst_52 = arith.constant 1.000000e+00 : f32
    %206 = vector.broadcast %cst_52 : f32 to vector<2x128xf32>
    %207 = arith.addf %206, %205 : vector<2x128xf32>
    %208 = arith.divf %206, %207 : vector<2x128xf32>
    %209 = vector.extract_strided_slice %202 {offsets = [0, 128], sizes = [2, 128], strides = [1, 1]} : vector<2x512xf32> to vector<2x128xf32>
    %210 = arith.negf %209 : vector<2x128xf32>
    %211 = math.exp %210 : vector<2x128xf32>
    %cst_53 = arith.constant 1.000000e+00 : f32
    %212 = vector.broadcast %cst_53 : f32 to vector<2x128xf32>
    %213 = arith.addf %212, %211 : vector<2x128xf32>
    %214 = arith.divf %212, %213 : vector<2x128xf32>
    %215 = vector.extract_strided_slice %202 {offsets = [0, 256], sizes = [2, 128], strides = [1, 1]} : vector<2x512xf32> to vector<2x128xf32>
    %216 = math.tanh %215 : vector<2x128xf32>
    %217 = vector.extract_strided_slice %202 {offsets = [0, 384], sizes = [2, 128], strides = [1, 1]} : vector<2x512xf32> to vector<2x128xf32>
    %218 = arith.negf %217 : vector<2x128xf32>
    %219 = math.exp %218 : vector<2x128xf32>
    %cst_54 = arith.constant 1.000000e+00 : f32
    %220 = vector.broadcast %cst_54 : f32 to vector<2x128xf32>
    %221 = arith.addf %220, %219 : vector<2x128xf32>
    %222 = arith.divf %220, %221 : vector<2x128xf32>
    %223 = arith.mulf %214, %189 : vector<2x128xf32>
    %224 = arith.mulf %208, %216 : vector<2x128xf32>
    %225 = arith.addf %223, %224 : vector<2x128xf32>
    %226 = math.tanh %225 : vector<2x128xf32>
    %227 = arith.mulf %222, %226 : vector<2x128xf32>
    %c1_i32_55 = arith.constant 1 : i32
    %228 = arith.addi %c5_i32, %c1_i32_55 : i32
    %229 = vector.broadcast %228 : i32 to vector<2x128xi32>
    %230 = arith.cmpi eq, %14, %229 : vector<2x128xi32>
    %231 = arith.select %230, %227, %195 : vector<2x128xi1>, vector<2x128xf32>
    %c6_i32 = arith.constant 6 : i32
    %232 = arith.index_cast %c6_i32 : i32 to index
    %c0_56 = arith.constant 0 : index
    %c0_57 = arith.constant 0 : index
    %233 = vector.load %arg9[%232, %c0_56, %c0_57] : memref<8x2x512xbf16, #tpu.memory_space<vmem>>, vector<1x2x512xbf16>
    %234 = vector.shape_cast %233 : vector<1x2x512xbf16> to vector<2x512xbf16>
    %235 = arith.extf %234 : vector<2x512xbf16> to vector<2x512xf32>
    %236 = arith.truncf %227 : vector<2x128xf32> to vector<2x128xbf16>
    %cst_58 = arith.constant dense<0.000000e+00> : vector<2x512xf32>
    %237 = tpu.matmul %236, %11, %cst_58 {dimension_numbers = #tpu.dot_dimension_numbers<[1], [0], [0], [1], [0, 0, 1, 1], [], []>} : vector<2x128xbf16>, vector<128x512xbf16>, vector<2x512xf32> -> vector<2x512xf32>
    %238 = arith.addf %235, %237 : vector<2x512xf32>
    %239 = vector.extract_strided_slice %238 {offsets = [0, 0], sizes = [2, 128], strides = [1, 1]} : vector<2x512xf32> to vector<2x128xf32>
    %240 = arith.negf %239 : vector<2x128xf32>
    %241 = math.exp %240 : vector<2x128xf32>
    %cst_59 = arith.constant 1.000000e+00 : f32
    %242 = vector.broadcast %cst_59 : f32 to vector<2x128xf32>
    %243 = arith.addf %242, %241 : vector<2x128xf32>
    %244 = arith.divf %242, %243 : vector<2x128xf32>
    %245 = vector.extract_strided_slice %238 {offsets = [0, 128], sizes = [2, 128], strides = [1, 1]} : vector<2x512xf32> to vector<2x128xf32>
    %246 = arith.negf %245 : vector<2x128xf32>
    %247 = math.exp %246 : vector<2x128xf32>
    %cst_60 = arith.constant 1.000000e+00 : f32
    %248 = vector.broadcast %cst_60 : f32 to vector<2x128xf32>
    %249 = arith.addf %248, %247 : vector<2x128xf32>
    %250 = arith.divf %248, %249 : vector<2x128xf32>
    %251 = vector.extract_strided_slice %238 {offsets = [0, 256], sizes = [2, 128], strides = [1, 1]} : vector<2x512xf32> to vector<2x128xf32>
    %252 = math.tanh %251 : vector<2x128xf32>
    %253 = vector.extract_strided_slice %238 {offsets = [0, 384], sizes = [2, 128], strides = [1, 1]} : vector<2x512xf32> to vector<2x128xf32>
    %254 = arith.negf %253 : vector<2x128xf32>
    %255 = math.exp %254 : vector<2x128xf32>
    %cst_61 = arith.constant 1.000000e+00 : f32
    %256 = vector.broadcast %cst_61 : f32 to vector<2x128xf32>
    %257 = arith.addf %256, %255 : vector<2x128xf32>
    %258 = arith.divf %256, %257 : vector<2x128xf32>
    %259 = arith.mulf %250, %225 : vector<2x128xf32>
    %260 = arith.mulf %244, %252 : vector<2x128xf32>
    %261 = arith.addf %259, %260 : vector<2x128xf32>
    %262 = math.tanh %261 : vector<2x128xf32>
    %263 = arith.mulf %258, %262 : vector<2x128xf32>
    %c1_i32_62 = arith.constant 1 : i32
    %264 = arith.addi %c6_i32, %c1_i32_62 : i32
    %265 = vector.broadcast %264 : i32 to vector<2x128xi32>
    %266 = arith.cmpi eq, %14, %265 : vector<2x128xi32>
    %267 = arith.select %266, %263, %231 : vector<2x128xi1>, vector<2x128xf32>
    %c7_i32 = arith.constant 7 : i32
    %268 = arith.index_cast %c7_i32 : i32 to index
    %c0_63 = arith.constant 0 : index
    %c0_64 = arith.constant 0 : index
    %269 = vector.load %arg9[%268, %c0_63, %c0_64] : memref<8x2x512xbf16, #tpu.memory_space<vmem>>, vector<1x2x512xbf16>
    %270 = vector.shape_cast %269 : vector<1x2x512xbf16> to vector<2x512xbf16>
    %271 = arith.extf %270 : vector<2x512xbf16> to vector<2x512xf32>
    %272 = arith.truncf %263 : vector<2x128xf32> to vector<2x128xbf16>
    %cst_65 = arith.constant dense<0.000000e+00> : vector<2x512xf32>
    %273 = tpu.matmul %272, %11, %cst_65 {dimension_numbers = #tpu.dot_dimension_numbers<[1], [0], [0], [1], [0, 0, 1, 1], [], []>} : vector<2x128xbf16>, vector<128x512xbf16>, vector<2x512xf32> -> vector<2x512xf32>
    %274 = arith.addf %271, %273 : vector<2x512xf32>
    %275 = vector.extract_strided_slice %274 {offsets = [0, 0], sizes = [2, 128], strides = [1, 1]} : vector<2x512xf32> to vector<2x128xf32>
    %276 = arith.negf %275 : vector<2x128xf32>
    %277 = math.exp %276 : vector<2x128xf32>
    %cst_66 = arith.constant 1.000000e+00 : f32
    %278 = vector.broadcast %cst_66 : f32 to vector<2x128xf32>
    %279 = arith.addf %278, %277 : vector<2x128xf32>
    %280 = arith.divf %278, %279 : vector<2x128xf32>
    %281 = vector.extract_strided_slice %274 {offsets = [0, 128], sizes = [2, 128], strides = [1, 1]} : vector<2x512xf32> to vector<2x128xf32>
    %282 = arith.negf %281 : vector<2x128xf32>
    %283 = math.exp %282 : vector<2x128xf32>
    %cst_67 = arith.constant 1.000000e+00 : f32
    %284 = vector.broadcast %cst_67 : f32 to vector<2x128xf32>
    %285 = arith.addf %284, %283 : vector<2x128xf32>
    %286 = arith.divf %284, %285 : vector<2x128xf32>
    %287 = vector.extract_strided_slice %274 {offsets = [0, 256], sizes = [2, 128], strides = [1, 1]} : vector<2x512xf32> to vector<2x128xf32>
    %288 = math.tanh %287 : vector<2x128xf32>
    %289 = vector.extract_strided_slice %274 {offsets = [0, 384], sizes = [2, 128], strides = [1, 1]} : vector<2x512xf32> to vector<2x128xf32>
    %290 = arith.negf %289 : vector<2x128xf32>
    %291 = math.exp %290 : vector<2x128xf32>
    %cst_68 = arith.constant 1.000000e+00 : f32
    %292 = vector.broadcast %cst_68 : f32 to vector<2x128xf32>
    %293 = arith.addf %292, %291 : vector<2x128xf32>
    %294 = arith.divf %292, %293 : vector<2x128xf32>
    %295 = arith.mulf %286, %261 : vector<2x128xf32>
    %296 = arith.mulf %280, %288 : vector<2x128xf32>
    %297 = arith.addf %295, %296 : vector<2x128xf32>
    %298 = math.tanh %297 : vector<2x128xf32>
    %299 = arith.mulf %294, %298 : vector<2x128xf32>
    %c1_i32_69 = arith.constant 1 : i32
    %300 = arith.addi %c7_i32, %c1_i32_69 : i32
    %301 = vector.broadcast %300 : i32 to vector<2x128xi32>
    %302 = arith.cmpi eq, %14, %301 : vector<2x128xi32>
    %303 = arith.select %302, %299, %267 : vector<2x128xi1>, vector<2x128xf32>
    %c8_i32 = arith.constant 8 : i32
    %304 = arith.truncf %303 : vector<2x128xf32> to vector<2x128xbf16>
    %c0_70 = arith.constant 0 : index
    %c0_71 = arith.constant 0 : index
    %305 = vector.load %arg6[%c0_70, %c0_71] : memref<128x128xbf16, #tpu.memory_space<vmem>>, vector<128x128xbf16>
    %cst_72 = arith.constant dense<0.000000e+00> : vector<2x128xf32>
    %306 = tpu.matmul %304, %305, %cst_72 {dimension_numbers = #tpu.dot_dimension_numbers<[1], [0], [0], [1], [0, 0, 1, 1], [], []>} : vector<2x128xbf16>, vector<128x128xbf16>, vector<2x128xf32> -> vector<2x128xf32>
    %c0_73 = arith.constant 0 : index
    %c0_74 = arith.constant 0 : index
    %307 = vector.load %arg7[%c0_73, %c0_74] : memref<1x128xf32, #tpu.memory_space<vmem>>, vector<1x128xf32>
    %308 = vector.broadcast %307 : vector<1x128xf32> to vector<2x128xf32>
    %309 = arith.addf %306, %308 : vector<2x128xf32>
    %c0_75 = arith.constant 0 : index
    %c0_76 = arith.constant 0 : index
    %310 = vector.load %arg8[%c0_75, %c0_76] : memref<2x128xf32, #tpu.memory_space<vmem>>, vector<2x128xf32>
    tpu.vector_store %arg8[%c0_75, %c0_76], %309 {strides = array<i32>} : memref<2x128xf32, #tpu.memory_space<vmem>>, vector<2x128xf32>,
    return
  }
  func.func @transform_0(%arg0: i32) -> (i32, i32, i32) {
    %c0_i32 = arith.constant 0 : i32
    %c0_i32_0 = arith.constant 0 : i32
    %c0_i32_1 = arith.constant 0 : i32
    return %c0_i32, %arg0, %c0_i32_0 : i32, i32, i32
  }
  func.func @transform_1(%arg0: i32) -> (i32, i32) {
    %c0_i32 = arith.constant 0 : i32
    %c0_i32_0 = arith.constant 0 : i32
    return %arg0, %c0_i32 : i32, i32
  }
  func.func @transform_2(%arg0: i32) -> (i32, i32) {
    %c0_i32 = arith.constant 0 : i32
    %c0_i32_0 = arith.constant 0 : i32
    %c0_i32_1 = arith.constant 0 : i32
    return %c0_i32, %c0_i32_0 : i32, i32
  }
  func.func @transform_3(%arg0: i32) -> (i32, i32) {
    %c0_i32 = arith.constant 0 : i32
    %c0_i32_0 = arith.constant 0 : i32
    %c0_i32_1 = arith.constant 0 : i32
    return %c0_i32, %c0_i32_0 : i32, i32
  }
  func.func @transform_4(%arg0: i32) -> (i32, i32) {
    %c0_i32 = arith.constant 0 : i32
    %c0_i32_0 = arith.constant 0 : i32
    %c0_i32_1 = arith.constant 0 : i32
    return %c0_i32, %c0_i32_0 : i32, i32
  }
  func.func @transform_5(%arg0: i32) -> (i32, i32) {
    %c0_i32 = arith.constant 0 : i32
    %c0_i32_0 = arith.constant 0 : i32
    %c0_i32_1 = arith.constant 0 : i32
    return %c0_i32, %c0_i32_0 : i32, i32
  }
  func.func @transform_6(%arg0: i32) -> (i32, i32) {
    %c0_i32 = arith.constant 0 : i32
    %c0_i32_0 = arith.constant 0 : i32
    %c0_i32_1 = arith.constant 0 : i32
    return %c0_i32, %c0_i32_0 : i32, i32
  }
  func.func @transform_7(%arg0: i32) -> (i32, i32) {
    %c0_i32 = arith.constant 0 : i32
    %c0_i32_0 = arith.constant 0 : i32
    return %arg0, %c0_i32 : i32, i32
  }
}

</mosaic_0001>

<bundles_post_ra>
// kernel: smcn_forward.3
= control target key start
LH: loop header
LB: loop body
LE: loop exit
PB: predicated region body
PF: predicated region fallthrough
CT: control target
= control target key end

     0   :  { %v857_v0 = vmov 0.0   ;;  %vm858_vm0 = vmmov 0   ;;  %vm92_vm1 = vcmask 261120   ;;  %v245_v13 = vlaneseq  ;;  %s1139_s7 = inlined_call_operand.vmem [shape: bf16[32,128], index: 7, kind: input, shape index: {}]   ;;  %s1140_s0 = inlined_call_operand.vmem [shape: bf16[2,8,32], index: 0, kind: input, shape index: {}]   ;;  %s1141_s9 = inlined_call_operand.vmem [shape: bf16[128,128], index: 9, kind: input, shape index: {}]   ;;  %s1142_s1 = inlined_call_operand.vmem [shape: bf16[2,8,32], index: 1, kind: input, shape index: {}]   ;;  %s1143_s2 = inlined_call_operand.vmem [shape: bf16[2,8,32], index: 2, kind: input, shape index: {}]   ;;  %s1144_s3 = inlined_call_operand.vmem [shape: f32[2,128], index: 3, kind: input, shape index: {}]   ;;  %s1145_s4 = inlined_call_operand.vmem [shape: f32[2,8], index: 4, kind: input, shape index: {}]   ;;  %s1146_s5 = inlined_call_operand.vmem [shape: f32[2,8], index: 5, kind: input, shape index: {}]   ;;  %s1147_s8 = inlined_call_operand.vmem [shape: f32[1,128], index: 8, kind: input, shape index: {}, may-alias: {8,10}]   ;;  %s1148_s10 = inlined_call_operand.vmem [shape: f32[1,128], index: 10, kind: input, shape index: {}, may-alias: {8,10}]   ;;  %s1149_s6 = inlined_call_operand.vmem [shape: f32[2,8], index: 6, kind: input, shape index: {}]   ;;  %s1150_s11 = inlined_call_operand.vmem [shape: f32[1,3,2], index: 11, kind: output, shape index: {}]  }
   0x1   :  { %748 = vmatprep.subr.bf16.mxu0 %v857_v0  ;;  %v925_v1 = vld [vmem:[%s1139_s7] sm:$0xff]   ;;  %752 = vmatprep.mubr.msk.bf16.mxu0 %vm858_vm0, %v857_v0  ;;  %v936_v2 = vld [vmem:[%s1139_s7 + $0x8] sm:$0xff]   ;;  %v965_v6 = vld [vmem:[%s1141_s9 + $0x10] sm:$0xff]   ;;  %vm63_vm2 = vcmask 1041408   ;;  %v859_v15 = vmov 1966171168  }
   0x2   :  { %756 = vmatprep.subr.bf16.mxu1 %v857_v0  ;;  %772 = vmatprep.mubr.msk.bf16.mxu1 %vm858_vm0, %v857_v0  ;;  %v942_v3 = vld [vmem:[%s1141_s9] sm:$0xff]   ;;  %v954_v5 = vld [vmem:[%s1141_s9 + $0x8] sm:$0xff]   ;;  %v977_v8 = vld [vmem:[%s1141_s9 + $0x18] sm:$0xff]   ;;  %v243_v16 = vunpack.c.l.s4 %v859_v15  ;;  %v246_v18 = vshrl.u32 %v245_v13, 7  ;;  %v331_v19 = vand.u32 127, %v245_v13  ;;  %vm298_vm3 = vcmask 58368  }
   0x3   :  { %749 = vmatpush3.bf16.msra.mxu0 %v925_v1  ;;  %v840_v4 = vld [vmem:[%s1140_s0] sm:$0xff]   ;;  %757 = vmatpush3.bf16.msra.mxu1 %v942_v3  ;;  %v998_v10 = vld [vmem:[%s1141_s9 + $0x28] sm:$0xff]   ;;  %v1014_v11 = vld [vmem:[%s1141_s9 + $0x30] sm:$0xff]   ;;  %vm340_vm4 = vcmask 1041409   ;;  %vm354_vm5 = vcmask 8192  }
   0x4   :  { %750 = vmatprep.subr.bf16.mxu0 %v857_v0  ;;  %758 = vmatprep.subr.bf16.mxu1 %v857_v0  ;;  %v841_v7 = vld [vmem:[%s1142_s1] sm:$0xff]   ;;  %v1023_v12 = vld [vmem:[%s1141_s9 + $0x38] sm:$0xff]   ;;  %v244_v20 = vunpack.c.0.s8 %v243_v16  ;;  %v1037_v23 = vsub.s32 %v331_v19, %v246_v18  ;;  %v1039_v24 = vsub.s32 0, %v246_v18  ;;  %v1053_v30 = vsub.s32 1, %v246_v18 }
   0x5   :  { %v989_v9 = vld [vmem:[%s1141_s9 + $0x20] sm:$0xff]  }
   0x6   :  { %v61_v14 = vld [vmem:[%s1144_s3] sm:$0x3]  ;;  %v1041_v25 = vsub.s32 %v244_v20, %v246_v18 }
   0x7   :  { %751 = vmatpush3.bf16.msra.mxu0 %v936_v2  ;;  %759 = vmatpush3.bf16.msra.mxu1 %v954_v5  ;;  %v62_v17 = vmul.f32 %v61_v14, %v61_v14  ;;  %v1035_v21 = vld [vmem:[%s1145_s4] sm:$0x3] }
   0x8   :  { %776 = vmatprep.subr.bf16.mxu0 %v857_v0  ;;  %760 = vmatprep.subr.bf16.mxu1 %v857_v0  ;;  %v1046_v26 = vld [vmem:[%s1146_s5] sm:$0x3]  ;;  %v307_v27 = vrot.slane %v1035_v21, %v1039_v24  ;;  %v248_v28 = vrot.slane %v61_v14, %v1041_v25  ;;  %v314_v35 = vrot.slane %v1035_v21, %v1053_v30 }
   0x9   :  { %v64_v22 = vsel %vm63_vm2, %v62_v17, 0.0  ;;  %v478_v29 = vrot.slane %v1046_v26, %v1039_v24  ;;  %v485_v34 = vrot.slane %v1046_v26, %v1053_v30  ;;  %v1064_v36 = vld [vmem:[%s1147_s8] ss:$0 sm:$0xff] }
   0xa   :  { %753 = vmatmul.mubr.msk.bf16.vlgmr.msra.gmra.mrb[0].mxu0 %vm92_vm1, %v840_v4  ;;  %65 = vadd.xlane.f32.xlu0 %v64_v22  ;;  %v249_v31 = vcombine.high %v248_v28, %v248_v28  ;;  %v256_v32 = vrot.slane %v248_v28, %v1041_v25  ;;  %v850_v55 = vld [vmem:[%s1143_s2] sm:$0xff]   ;;  %v860_v28 = vmov 0  }
   0xb   :  { %777 = vmatpush3.bf16.msra.mxu0 %v925_v1  ;;  %780 = vmatprep.mubr.msk.bf16.mxu0 %vm858_vm0, %v857_v0  ;;  %v699_v56 = vld [vmem:[%s1148_s10] ss:$0 sm:$0xff] }
   0xc   :  { %778 = vmatprep.subr.bf16.mxu0 %v857_v0  ;;  %761 = vmatpush3.bf16.msra.mxu1 %v965_v6  ;;  %v263_v33 = vrot.slane %v249_v31, %v1041_v25  ;;  %v267_v57 = vrot.slane %v256_v32, %v1039_v24 }
   0xd   :  { %762 = vmatprep.subr.bf16.mxu1 %v857_v0  ;;  %309 = vbcast.lane.b32.xlu1 %v307_v27, 256 }
   0xe   :  { %836 = vset.pattern.permute.xlu1 %v860_v28  ;;  %837 = vset.pattern.permute.xlu0 %v860_v28 }
   0xf   :  { %779 = vmatpush3.bf16.msra.mxu0 %v936_v2 }
  0x10   :  { %784 = vmatprep.subr.bf16.mxu0 %v857_v0  ;;  %763 = vmatpush3.bf16.msra.mxu1 %v977_v8 }
  0x11   :  { %764 = vmatprep.subr.bf16.mxu1 %v857_v0  ;;  %480 = vbcast.lane.b32.xlu1 %v478_v29, 256 }
  0x12   :  { %781 = vmatmul.mubr.msk.bf16.vlgmr.msra.gmra.mrb[4].mxu0 %vm92_vm1, %v841_v7 }
  0x13   :  { %785 = vmatpush3.bf16.msra.mxu0 %v942_v3  ;;  %800 = vmatprep.mubr.msk.bf16.mxu0 %vm858_vm0, %v857_v0 }
  0x14   :  { %786 = vmatprep.subr.bf16.mxu0 %v857_v0  ;;  %765 = vmatpush3.bf16.msra.mxu1 %v989_v9 }
  0x15   :  { %766 = vmatprep.subr.bf16.mxu1 %v857_v0  ;;  %487 = vbcast.lane.b32.xlu1 %v485_v34, 256 }
  0x17   :  { %787 = vmatpush3.bf16.msra.mxu0 %v954_v5 }
  0x18   :  { %788 = vmatprep.subr.bf16.mxu0 %v857_v0  ;;  %767 = vmatpush3.bf16.msra.mxu1 %v998_v10 }
  0x19   :  { %768 = vmatprep.subr.bf16.mxu1 %v857_v0 }
  0x1b   :  { %789 = vmatpush3.bf16.msra.mxu0 %v965_v6 }
  0x1c   :  { %790 = vmatprep.subr.bf16.mxu0 %v857_v0  ;;  %769 = vmatpush3.bf16.msra.mxu1 %v1014_v11 }
  0x1d   :  { %770 = vmatprep.subr.bf16.mxu1 %v857_v0 }
  0x1f   :  { %791 = vmatpush3.bf16.msra.mxu0 %v977_v8 }
  0x20   :  { %792 = vmatprep.subr.bf16.mxu0 %v857_v0  ;;  %771 = vmatpush3.bf16.msra.mxu1 %v1023_v12 }
  0x21   :  { %812 = vmatprep.subr.bf16.mxu1 %v857_v0  ;;  %316 = vbcast.lane.b32.xlu0 %v314_v35, 256 }
  0x23   :  { %793 = vmatpush3.bf16.msra.mxu0 %v989_v9 }
  0x24   :  { %794 = vmatprep.subr.bf16.mxu0 %v857_v0 }
  0x27   :  { %795 = vmatpush3.bf16.msra.mxu0 %v998_v10 }
  0x28   :  { %796 = vmatprep.subr.bf16.mxu0 %v857_v0 }
  0x2b   :  { %797 = vmatpush3.bf16.msra.mxu0 %v1014_v11 }
  0x2c   :  { %798 = vmatprep.subr.bf16.mxu0 %v857_v0 }
  0x2f   :  { %799 = vmatpush3.bf16.msra.mxu0 %v1023_v12 }
  0x30   :  { %804 = vmatprep.subr.bf16.mxu0 %v857_v0 }
  0x7f   :  { %v310_v29 = vpop.permute.xlu1 %309 }
  0x83   :  { %v481_v31 = vpop.permute.xlu1 %480 }
  0x97   :  { %v66_v32 = vpop.xlane.xlu0 %65 }
  0xdd   :  { %v130_v37 = vpop.f32.mrb[0].mxu0 }
  0xde   :  { %v131_v38 = vadd.f32 %v1064_v36, %v130_v37  ;;  %v754_v39 = vpop.f32.mrb[1].mxu0 }
  0xdf   :  { %v133_v40 = vpop.f32.mrb[2].mxu0  ;;  %v317_v39 = vpop.permute.xlu0 %316 }
  0xe0   :  { %v134_v41 = vadd.f32 %v1064_v36, %v133_v40  ;;  %v755_v42 = vpop.f32.mrb[3].mxu0  ;;  %v137_v43 = vmax.f32 %v131_v38, 0.0 }
  0xe2   :  { %v138_v44 = vmax.f32 %v134_v41, 0.0 }
  0xe4   :  { %v139_v45 = vpack.c.bf16 %v138_v44, %v137_v43 }
  0xe5   :  { %v400_v46 = vpop.f32.mrb[4].mxu0 }
  0xe6   :  { %v401_v47 = vadd.f32 %v1064_v36, %v400_v46  ;;  %773 = vmatmul.mubr.bf16.vlgmr.msra.gmra.mrb[0].mxu1 %v139_v45  ;;  %v782_v48 = vpop.f32.mrb[5].mxu0 }
  0xe7   :  { %v403_v49 = vpop.f32.mrb[6].mxu0  ;;  %813 = vmatpush3.bf16.msra.mxu1 %v942_v3  ;;  %828 = vmatprep.mubr.msk.bf16.mxu1 %vm858_vm0, %v857_v0  ;;  %v271_v3 = vrot.slane %v263_v33, %v1039_v24  ;;  %v488_v33 = vpop.permute.xlu1 %487 }
  0xe8   :  { %v404_v50 = vadd.f32 %v1064_v36, %v403_v49  ;;  %v783_v51 = vpop.f32.mrb[7].mxu0  ;;  %814 = vmatprep.subr.bf16.mxu1 %v857_v0  ;;  %v407_v52 = vmax.f32 %v401_v47, 0.0 }
  0xe9   :  { %v636_v51 = vld [vmem:[%s1149_s6] sm:$0x3] }
  0xea   :  { %v408_v53 = vmax.f32 %v404_v50, 0.0 }
  0xeb   :  { %815 = vmatpush3.bf16.msra.mxu1 %v954_v5 }
  0xec   :  { %v409_v54 = vpack.c.bf16 %v408_v53, %v407_v52  ;;  %816 = vmatprep.subr.bf16.mxu1 %v857_v0  ;;  %v288_v52 = vrot.slane %v66_v32, %v1039_v24 }
  0xee   :  { %801 = vmatmul.mubr.bf16.vlgmr.msra.gmra.mrb[8].mxu0 %v409_v54 }
  0xef   :  { %805 = vmatpush3.bf16.msra.mxu0 %v925_v1  ;;  %808 = vmatprep.mubr.msk.bf16.mxu0 %vm858_vm0, %v857_v0 }
  0xf0   :  { %806 = vmatprep.subr.bf16.mxu0 %v857_v0  ;;  %817 = vmatpush3.bf16.msra.mxu1 %v965_v6 }
  0xf1   :  { %818 = vmatprep.subr.bf16.mxu1 %v857_v0 }
  0xf3   :  { %807 = vmatpush3.bf16.msra.mxu0 %v936_v2 }
  0xf4   :  { %819 = vmatpush3.bf16.msra.mxu1 %v977_v8 }
  0xf5   :  { %820 = vmatprep.subr.bf16.mxu1 %v857_v0 }
  0xf6   :  { %809 = vmatmul.mubr.msk.bf16.vlgmr.msra.gmra.mrb[12].mxu0 %vm92_vm1, %v850_v55 }
  0xf8   :  { %821 = vmatpush3.bf16.msra.mxu1 %v989_v9 }
  0xf9   :  { %822 = vmatprep.subr.bf16.mxu1 %v857_v0 }
  0xfc   :  { %823 = vmatpush3.bf16.msra.mxu1 %v998_v10 }
  0xfd   :  { %824 = vmatprep.subr.bf16.mxu1 %v857_v0 }
 0x100   :  { %825 = vmatpush3.bf16.msra.mxu1 %v1014_v11 }
 0x101   :  { %826 = vmatprep.subr.bf16.mxu1 %v857_v0 }
 0x104   :  { %827 = vmatpush3.bf16.msra.mxu1 %v1023_v12 }
 0x1b9   :  { %v228_v58 = vpop.f32.mrb[0].mxu1 }
 0x1ba   :  { %v229_v59 = vadd.f32 %v699_v56, %v228_v58  ;;  %v774_v60 = vpop.f32.mrb[1].mxu1 }
 0x1bb   :  { %v231_v61 = vpop.f32.mrb[2].mxu1 }
 0x1bc   :  { %v232_v62 = vadd.f32 %v699_v56, %v231_v61  ;;  %v775_v63 = vpop.f32.mrb[3].mxu1  ;;  %v274_v1 = vmul.f32 %v267_v57, %v229_v59  ;;  %v235_v2 = vmul.f32 %v229_v59, %v229_v59 }
 0x1be   :  { %276 = vadd.xlane.f32.xlu0 %v274_v1  ;;  %237 = vadd.xlane.f32.xlu1 %v235_v2  ;;  %v275_v0 = vmul.f32 %v271_v3, %v232_v62  ;;  %v236_v10 = vmul.f32 %v232_v62, %v232_v62  ;;  %v292_v62 = vrot.slane %v66_v32, %v1053_v30 }
 0x1bf   :  { %v652_v2 = vrot.slane %v636_v51, %v1053_v30 }
 0x1c1   :  { %v444_v4 = vpop.f32.mrb[8].mxu0 }
 0x1c2   :  { %v445_v5 = vadd.f32 %v699_v56, %v444_v4  ;;  %278 = vadd.xlane.f32.xlu0 %v275_v0  ;;  %v802_v6 = vpop.f32.mrb[9].mxu0 }
 0x1c3   :  { %v447_v7 = vpop.f32.mrb[10].mxu0 }
 0x1c4   :  { %v448_v8 = vadd.f32 %v699_v56, %v447_v7  ;;  %v803_v9 = vpop.f32.mrb[11].mxu0  ;;  %v457_v11 = vmul.f32 %v445_v5, %v267_v57  ;;  %v451_v12 = vmul.f32 %v445_v5, %v445_v5 }
 0x1c6   :  { %239 = vadd.xlane.f32.xlu0 %v236_v10  ;;  %459 = vadd.xlane.f32.xlu1 %v457_v11  ;;  %v452_v13 = vmul.f32 %v448_v8, %v448_v8  ;;  %v458_v20 = vmul.f32 %v448_v8, %v271_v3 }
 0x1c9   :  { %v567_v14 = vpop.f32.mrb[12].mxu0 }
 0x1ca   :  { %v568_v15 = vadd.f32 %v1064_v36, %v567_v14  ;;  %453 = vadd.xlane.f32.xlu1 %v451_v12  ;;  %455 = vadd.xlane.f32.xlu0 %v452_v13  ;;  %v810_v16 = vpop.f32.mrb[13].mxu0 }
 0x1cb   :  { %v570_v17 = vpop.f32.mrb[14].mxu0 }
 0x1cc   :  { %v571_v18 = vadd.f32 %v1064_v36, %v570_v17  ;;  %v811_v19 = vpop.f32.mrb[15].mxu0  ;;  %v574_v22 = vmax.f32 %v568_v15, 0.0 }
 0x1ce   :  { %v575_v25 = vmax.f32 %v571_v18, 0.0  ;;  %461 = vadd.xlane.f32.xlu1 %v458_v20 }
 0x1d0   :  { %v576_v27 = vpack.c.bf16 %v575_v25, %v574_v22 }
 0x1d2   :  { %829 = vmatmul.mubr.bf16.vlgmr.msra.gmra.mrb[4].mxu1 %v576_v27 }
 0x24b   :  { %v238_v43 = vpop.xlane.xlu1 %237  ;;  %v277_v46 = vpop.xlane.xlu0 %276 }
 0x24c   :  { %v280_v50 = vmul.f32 2.0, %v277_v46 }
 0x24e   :  { %v282_v53 = vsub.f32 %v238_v43, %v280_v50 }
 0x24f   :  { %v279_v48 = vpop.xlane.xlu0 %278 }
 0x250   :  { %v281_v58 = vmul.f32 2.0, %v279_v48  ;;  %v295_v59 = vadd.f32 %v288_v52, %v282_v53 }
 0x252   :  { %v320_v4 = vmul.f32 %v310_v29, %v295_v59  ;;  %v299_v29 = vsel %vm298_vm3, %v1035_v21, 0.0 }
 0x253   :  { %v460_v47 = vpop.xlane.xlu1 %459  ;;  %v240_v54 = vpop.xlane.xlu0 %239 }
 0x254   :  { %v283_v63 = vsub.f32 %v240_v54, %v281_v58 }
 0x256   :  { %v296_v5 = vadd.f32 %v292_v62, %v283_v63 }
 0x257   :  { %v454_v49 = vpop.xlane.xlu1 %453  ;;  %v456_v1 = vpop.xlane.xlu0 %455 }
 0x25b   :  { %v462_v55 = vpop.xlane.xlu1 %461 }
 0x25c   :  { %v464_v61 = vmul.f32 2.0, %v462_v55 }
 0x25e   :  { %v466_v0 = vsub.f32 %v456_v1, %v464_v61 }
 0x260   :  { %v468_v6 = vadd.f32 %v466_v0, %v292_v62 }
 0x262   :  { %v492_v8 = vmul.f32 %v488_v33, %v468_v6  ;;  %v637_v33 = vsel %vm298_vm3, %v636_v51, 0.0 }
 0x2a5   :  { %v611_v34 = vpop.f32.mrb[4].mxu1 }
 0x2a6   :  { %v612_v35 = vadd.f32 %v699_v56, %v611_v34  ;;  %v830_v37 = vpop.f32.mrb[5].mxu1 }
 0x2a7   :  { %v614_v38 = vpop.f32.mrb[6].mxu1  ;;  %v470_v37 = vsel %vm298_vm3, %v1046_v26, 0.0 }
 0x2a8   :  { %v615_v36 = vadd.f32 %v699_v56, %v614_v38  ;;  %v831_v40 = vpop.f32.mrb[7].mxu1  ;;  %v624_v41 = vmul.f32 %v612_v35, %v267_v57  ;;  %v618_v42 = vmul.f32 %v612_v35, %v612_v35  ;;  %v463_v56 = vmul.f32 2.0, %v460_v47 }
 0x2a9   :  { %v645_v57 = vrot.slane %v636_v51, %v1039_v24  ;;  %v321_v24 = vmul.f32 %v317_v39, %v296_v5 }
 0x2aa   :  { %626 = vadd.xlane.f32.xlu0 %v624_v41  ;;  %620 = vadd.xlane.f32.xlu1 %v618_v42  ;;  %v625_v44 = vmul.f32 %v615_v36, %v271_v3  ;;  %v619_v45 = vmul.f32 %v615_v36, %v615_v36  ;;  %v465_v60 = vsub.f32 %v454_v49, %v463_v56 }
 0x2ac   :  { %v467_v3 = vadd.f32 %v465_v60, %v288_v52 }
 0x2ae   :  { %628 = vadd.xlane.f32.xlu1 %v625_v44  ;;  %622 = vadd.xlane.f32.xlu0 %v619_v45  ;;  %v491_v7 = vmul.f32 %v481_v31, %v467_v3 }
 0x2bf   :  { %647 = vbcast.lane.b32.xlu1 %v645_v57, 256 }
 0x2c3   :  { %325 = vperm.xlu1 %836, %v320_v4  }
 0x2c4   :  { %654 = vbcast.lane.b32.xlu0 %v652_v2, 256 }
 0x2c7   :  { %496 = vperm.xlu1 %836, %v491_v7  }
 0x2c8   :  { %328 = vperm.xlu0 %837, %v321_v24  }
 0x2cb   :  { %499 = vperm.xlu1 %836, %v492_v8  }
 0x337   :  { %v627_v9 = vpop.xlane.xlu0 %626  ;;  %v621_v10 = vpop.xlane.xlu1 %620 }
 0x338   :  { %v630_v11 = vmul.f32 2.0, %v627_v9 }
 0x33a   :  { %v632_v12 = vsub.f32 %v621_v10, %v630_v11 }
 0x33b   :  { %v629_v13 = vpop.xlane.xlu1 %628  ;;  %v623_v14 = vpop.xlane.xlu0 %622 }
 0x33c   :  { %v631_v30 = vmul.f32 2.0, %v629_v13  ;;  %v634_v16 = vadd.f32 %v632_v12, %v288_v52 }
 0x33e   :  { %v633_v15 = vsub.f32 %v623_v14, %v631_v30 }
 0x33f   :  { %v648_v17 = vpop.permute.xlu1 %647  ;;  %v655_v18 = vpop.permute.xlu0 %654 }
 0x340   :  { %v658_v19 = vmul.f32 %v648_v17, %v634_v16  ;;  %v635_v20 = vadd.f32 %v633_v15, %v292_v62 }
 0x342   :  { %v659_v22 = vmul.f32 %v655_v18, %v635_v20  ;;  %663 = vperm.xlu0 %837, %v658_v19  }
 0x343   :  { %v326_v25 = vpop.permute.xlu1 %325 }
 0x344   :  { %666 = vperm.xlu1 %836, %v659_v22   ;;  %v335_v34 = vrot.slane %v326_v25, %v1037_v23 }
 0x347   :  { %v497_v27 = vpop.permute.xlu1 %496  ;;  %v329_v28 = vpop.permute.xlu0 %328 }
 0x348   :  { %v339_v31 = vrot.slane %v329_v28, %v1037_v23  ;;  %v504_v39 = vrot.slane %v497_v27, %v1037_v23 }
 0x34a   :  { %v341_v38 = vsel %vm340_vm4, %v339_v31, %v335_v34 }
 0x34b   :  { %v500_v32 = vpop.permute.xlu1 %499  ;;  %v343_v21 = vsel %vm298_vm3, %v341_v38, 0.0 }
 0x34c   :  { %v508_v35 = vrot.slane %v500_v32, %v1037_v23 }
 0x34e   :  { %v509_v36 = vsel %vm340_vm4, %v508_v35, %v504_v39 }
 0x34f   :  { %v511_v40 = vsel %vm298_vm3, %v509_v36, 0.0 }
 0x361   :  { %300 = vadd.xlane.f32.xlu0 %v299_v29 }
 0x365   :  { %638 = vadd.xlane.f32.xlu0 %v637_v33 }
 0x368   :  { %471 = vadd.xlane.f32.xlu1 %v470_v37 }
 0x369   :  { %344 = vadd.xlane.f32.xlu0 %v343_v21 }
 0x36d   :  { %512 = vadd.xlane.f32.xlu0 %v511_v40 }
 0x3c1   :  { %v664_v41 = vpop.permute.xlu0 %663 }
 0x3c2   :  { %v671_v43 = vrot.slane %v664_v41, %v1037_v23 }
 0x3c3   :  { %v667_v42 = vpop.permute.xlu1 %666 }
 0x3c4   :  { %v675_v44 = vrot.slane %v667_v42, %v1037_v23 }
 0x3c6   :  { %v676_v26 = vsel %vm340_vm4, %v675_v44, %v671_v43 }
 0x3c7   :  { %v678_v45 = vsel %vm298_vm3, %v676_v26, 0.0 }
 0x3c8   :  { %679 = vadd.xlane.f32.xlu1 %v678_v45 }
 0x3ee   :  { %v301_v46 = vpop.xlane.xlu0 %300 }
 0x3ef   :  { %v302_v47 = vmax.f32 %v301_v46, 1.0 }
 0x3f1   :  { %851 = vrcp.f32 %v302_v47 }
 0x3f2   :  { %v639_v48 = vpop.xlane.xlu0 %638 }
 0x3f3   :  { %v640_v59 = vmax.f32 %v639_v48, 1.0 }
 0x3f5   :  { %v472_v49 = vpop.xlane.xlu1 %471 }
 0x3f6   :  { %v473_v50 = vmax.f32 %v472_v49, 1.0  ;;  %v345_v52 = vpop.xlane.xlu0 %344 }
 0x3f8   :  { %853 = vrcp.f32 %v473_v50 }
 0x3f9   :  { %855 = vrcp.f32 %v640_v59 }
 0x3fa   :  { %v513_v56 = vpop.xlane.xlu0 %512 }
 0x3fb   :  { %v852_v51 = vpop.eup %851 }
 0x3fc   :  { %v347_v53 = vmul.f32 %v852_v51, %v345_v52 }
 0x3fe   :  { %v352_v54 = vrot.slane %v347_v53, %v1037_v23 }
 0x400   :  { %355 = vst.msk [vmem:[%s1150_s11] sm:$0x1] %vm354_vm5, %v352_v54 }
 0x402   :  { %v854_v55 = vpop.eup %853 }
 0x403   :  { %v515_v57 = vmul.f32 %v854_v55, %v513_v56  ;;  %v856_v60 = vpop.eup %855 }
 0x405   :  { %v520_v58 = vrot.slane %v515_v57, %v1037_v23 }
 0x407   :  { %522 = vst.msk [vmem:[%s1150_s11 + $0x1] sm:$0x1] %vm354_vm5, %v520_v58 }
 0x455   :  { %v680_v61 = vpop.xlane.xlu1 %679 }
 0x456   :  { %v682_v62 = vmul.f32 %v856_v60, %v680_v61 }
 0x458   :  { %v687_v63 = vrot.slane %v682_v62, %v1037_v23 }
 0x45a   :  { %689 = vst.msk [vmem:[%s1150_s11 + $0x2] sm:$0x1] %vm354_vm5, %v687_v63 }

// kernel: smcn_forward.2
= control target key start
LH: loop header
LB: loop body
LE: loop exit
PB: predicated region body
PF: predicated region fallthrough
CT: control target
= control target key end

     0   :  { %v48_v0 = vlaneseq  ;;  %v3433_v2 = vmov 0   ;;  %v2544_v3 = vmov 1983009808   ;;  %vm126_vm0 = vcmask 130048   ;;  %s3425_s2 = inlined_call_operand.vmem [shape: bf16[16,512], index: 2, kind: input, shape index: {}]   ;;  %s3426_s0 = inlined_call_operand.vmem [shape: f32[8,2,16], index: 0, kind: input, shape index: {}]   ;;  %s3427_s3 = inlined_call_operand.vmem [shape: bf16[128,512], index: 3, kind: input, shape index: {}]   ;;  %s3428_s1 = inlined_call_operand.vmem [shape: s32[2,1], index: 1, kind: input, shape index: {}]   ;;  %s3429_s4 = inlined_call_operand.vmem [shape: f32[1,512], index: 4, kind: input, shape index: {}]   ;;  %s3430_s5 = inlined_call_operand.vmem [shape: bf16[128,128], index: 5, kind: input, shape index: {}]   ;;  %s3431_s6 = inlined_call_operand.vmem [shape: f32[1,128], index: 6, kind: input, shape index: {}]   ;;  %s3432_s7 = inlined_call_operand.vmem [shape: f32[2,128], index: 7, kind: output, shape index: {}]  }
   0x1   :  { %v2321_v1 = vld [vmem:[%s3425_s2 + $0x4] ss:$16 sps:$4 sm:$0xff]   ;;  %162 = vmatprep.mubr.bf16.mxu1 %v3433_v2  ;;  %v46_v4 = vunpack.c.l.s4 %v2544_v3  ;;  %966 = vmatprep.mubr.bf16.mxu0 %v3433_v2  ;;  %v2323_v5 = vld [vmem:[%s3425_s2] ss:$16 sps:$4 sm:$0xff]   ;;  %v2326_v7 = vld [vmem:[%s3425_s2 + $0xc] ss:$16 sps:$4 sm:$0xff]  }
   0x2   :  { %v2596_v6 = vshrl.u32 %v48_v0, 7  ;;  %2320 = vset.pattern.permute.xlu0 %v3433_v2  ;;  %130 = vmatprep.subr.bf16.mxu1 %v2321_v1  ;;  %v27_v8 = vld [vmem:[%s3426_s0] sm:$0x3]  ;;  %v28_v10 = vld [vmem:[%s3426_s0 + $0x2] sm:$0x3]  ;;  %vm2547_vm8 = vmmov 0  }
   0x3   :  { %v47_v9 = vunpack.c.0.s8 %v46_v4  ;;  %131 = vmatpush1.bf16.msra.mxu1 %v2323_v5  ;;  %v29_v11 = vld [vmem:[%s3426_s0 + $0x4] sm:$0x3]  ;;  %v30_v12 = vld [vmem:[%s3426_s0 + $0x6] sm:$0x3]  ;;  %v31_v13 = vld [vmem:[%s3426_s0 + $0x8] sm:$0x3]  ;;  %v43_v16 = vcombine.low %v27_v8, %v28_v10 }
   0x4   :  { %173 = vmatprep.subr.bf16.mxu1 %v2326_v7  ;;  %v32_v14 = vld [vmem:[%s3426_s0 + $0xa] sm:$0x3]  ;;  %v33_v15 = vld [vmem:[%s3426_s0 + $0xc] sm:$0x3]  ;;  %v44_v17 = vcombine.low %v29_v11, %v30_v12  ;;  %v34_v19 = vld [vmem:[%s3426_s0 + $0xe] sm:$0x3] }
   0x5   :  { %v2624_v18 = vsub.s32 %v47_v9, %v2596_v6  ;;  %v60_v20 = vcombine.low %v31_v13, %v32_v14  ;;  %v61_v23 = vcombine.low %v33_v15, %v34_v19  ;;  %v2634_v24 = vld [vmem:[%s3427_s3 + $0x4] ss:$16 sps:$4 sm:$0xff]   ;;  %v2639_v25 = vld [vmem:[%s3427_s3] ss:$16 sps:$4 sm:$0xff]   ;;  %v2324_v32 = vld [vmem:[%s3425_s2 + $0x8] ss:$16 sps:$4 sm:$0xff]  }
   0x6   :  { %3443 = vst [vmem:[#allocation3_spill] sm:$0xff] %v2634_v24  ;;  %934 = vmatprep.subr.bf16.mxu0 %v2634_v24  ;;  %v2647_v29 = vld [vmem:[%s3427_s3 + $0x24] ss:$16 sps:$4 sm:$0xff]   ;;  %v2653_v30 = vld [vmem:[%s3427_s3 + $0x20] ss:$16 sps:$4 sm:$0xff]   ;;  %v88_v63 = vsub.s32 0, %v2596_v6 }
   0x7   :  { %v51_v21 = vrot.slane %v43_v16, %v2624_v18  ;;  %v58_v22 = vrot.slane %v44_v17, %v2624_v18  ;;  %v68_v26 = vrot.slane %v60_v20, %v2624_v18  ;;  %v75_v28 = vrot.slane %v61_v23, %v2624_v18  ;;  %935 = vmatpush1.bf16.msra.mxu0 %v2639_v25  ;;  %v2662_v33 = vld [vmem:[%s3427_s3 + $0x44] ss:$16 sps:$4 sm:$0xff]   ;;  %v2667_v35 = vld [vmem:[%s3427_s3 + $0xc] ss:$16 sps:$4 sm:$0xff]   ;;  %v2673_v36 = vld [vmem:[%s3427_s3 + $0x40] ss:$16 sps:$4 sm:$0xff]  }
   0x8   :  { %936 = vmatprep.subr.bf16.mxu0 %v2647_v29  ;;  %3444 = vst [vmem:[#allocation4_spill] sm:$0xff] %v2667_v35  ;;  %v2680_v37 = vld [vmem:[%s3427_s3 + $0x64] ss:$16 sps:$4 sm:$0xff]   ;;  %v2688_v38 = vld [vmem:[%s3427_s3 + $0x60] ss:$16 sps:$4 sm:$0xff]   ;;  %v92_v1 = vsub.s32 1, %v2596_v6 }
   0x9   :  { %v59_v27 = vcombine.low %v51_v21, %v58_v22  ;;  %v76_v31 = vcombine.low %v68_v26, %v75_v28  ;;  %v2694_v39 = vld [vmem:[%s3427_s3 + $0x84] ss:$16 sps:$4 sm:$0xff]   ;;  %v2699_v40 = vld [vmem:[%s3427_s3 + $0x8] ss:$16 sps:$4 sm:$0xff]   ;;  %v2704_v41 = vld [vmem:[%s3427_s3 + $0x2c] ss:$16 sps:$4 sm:$0xff]  }
   0xa   :  { %v2710_v42 = vld [vmem:[%s3427_s3 + $0x80] ss:$16 sps:$4 sm:$0xff]   ;;  %v2717_v43 = vld [vmem:[%s3427_s3 + $0xa4] ss:$16 sps:$4 sm:$0xff]   ;;  %v2723_v44 = vld [vmem:[%s3427_s3 + $0x28] ss:$16 sps:$4 sm:$0xff]  }
   0xb   :  { %v79_v34 = vpack.c.bf16 %v76_v31, %v59_v27  ;;  %937 = vmatpush1.bf16.msra.mxu0 %v2653_v30  ;;  %v2730_v45 = vld [vmem:[%s3427_s3 + $0x4c] ss:$16 sps:$4 sm:$0xff]   ;;  %v2736_v46 = vld [vmem:[%s3427_s3 + $0xa0] ss:$16 sps:$4 sm:$0xff]   ;;  %v2742_v47 = vld [vmem:[%s3427_s3 + $0xc4] ss:$16 sps:$4 sm:$0xff]  }
   0xc   :  { %938 = vmatprep.subr.bf16.mxu0 %v2662_v33  ;;  %v768_v48 = vld [vmem:[%s3428_s1] sm:$0x3]  ;;  %v2751_v49 = vld [vmem:[%s3427_s3 + $0x48] ss:$16 sps:$4 sm:$0xff]   ;;  %v2757_v50 = vld [vmem:[%s3427_s3 + $0x6c] ss:$16 sps:$4 sm:$0xff]  }
   0xd   :  { %2187 = vmatmul.mubr.msk.bf16.vlgmr.msra.gmra.mrb[0].mxu1 %vm126_vm0, %v79_v34  ;;  %770 = vperm.xlu0 %2320, %v768_v48   ;;  %v2763_v51 = vld [vmem:[%s3427_s3 + $0xc0] ss:$16 sps:$4 sm:$0xff]   ;;  %v2769_v52 = vld [vmem:[%s3427_s3 + $0xe4] ss:$16 sps:$4 sm:$0xff]   ;;  %v2775_v53 = vld [vmem:[%s3427_s3 + $0x68] ss:$16 sps:$4 sm:$0xff]  }
   0xe   :  { %174 = vmatpush1.bf16.msra.mxu1 %v2324_v32  ;;  %205 = vmatprep.mubr.bf16.mxu1 %v3433_v2  ;;  %v2781_v54 = vld [vmem:[%s3427_s3 + $0x8c] ss:$16 sps:$4 sm:$0xff]   ;;  %v2787_v55 = vld [vmem:[%s3427_s3 + $0xe0] ss:$16 sps:$4 sm:$0xff]   ;;  %v2794_v56 = vld [vmem:[%s3427_s3 + $0x88] ss:$16 sps:$4 sm:$0xff]  }
   0xf   :  { %975 = vmatprep.subr.bf16.mxu1 %v2667_v35  ;;  %939 = vmatpush1.bf16.msra.mxu0 %v2673_v36  ;;  %3445 = vst [vmem:[#allocation5_spill] sm:$0xff] %v2787_v55  ;;  %v2800_v57 = vld [vmem:[%s3427_s3 + $0xac] ss:$16 sps:$4 sm:$0xff]   ;;  %v2808_v58 = vld [vmem:[%s3427_s3 + $0xa8] ss:$16 sps:$4 sm:$0xff]   ;;  %v96_v9 = vsub.s32 2, %v2596_v6 }
  0x10   :  { %940 = vmatprep.subr.bf16.mxu0 %v2680_v37  ;;  %v2814_v59 = vld [vmem:[%s3427_s3 + $0xcc] ss:$16 sps:$4 sm:$0xff]   ;;  %v2824_v60 = vld [vmem:[%s3427_s3 + $0xc8] ss:$16 sps:$4 sm:$0xff]   ;;  %v84_v0 = vld [vmem:[%s3429_s4] sm:$0xf] }
  0x11   :  { %v2830_v61 = vld [vmem:[%s3427_s3 + $0xec] ss:$16 sps:$4 sm:$0xff]   ;;  %v2838_v62 = vld [vmem:[%s3427_s3 + $0xe8] ss:$16 sps:$4 sm:$0xff]   ;;  %v89_v3 = vrot.slane %v84_v0, %v88_v63  ;;  %v93_v4 = vrot.slane %v84_v0, %v92_v1  ;;  %v100_v12 = vsub.s32 3, %v2596_v6  ;;  %v97_v19 = vrot.slane %v84_v0, %v96_v9 }
  0x12   :  { %3446 = vst [vmem:[#allocation6_spill] sm:$0xff] %v2838_v62  ;;  %v2545_v23 = vmov 1966171168  }
  0x13   :  { %941 = vmatpush1.bf16.msra.mxu0 %v2688_v38  ;;  %v101_v22 = vrot.slane %v84_v0, %v100_v12  ;;  %v531_v26 = vunpack.c.l.s4 %v2545_v23 }
  0x14   :  { %942 = vmatprep.subr.bf16.mxu0 %v2694_v39 }
  0x15   :  { %2188 = vmatmul.mubr.msk.bf16.vlgmr.msra.gmra.mrb[4].mxu1 %vm126_vm0, %v79_v34  ;;  %v532_v48 = vunpack.c.0.s8 %v531_v26 }
  0x16   :  { %976 = vmatpush1.bf16.msra.mxu1 %v2699_v40  ;;  %1007 = vmatprep.mubr.bf16.mxu1 %v3433_v2 }
  0x17   :  { %977 = vmatprep.subr.bf16.mxu1 %v2704_v41  ;;  %943 = vmatpush1.bf16.msra.mxu0 %v2710_v42  ;;  %v2893_v12 = vsub.s32 %v532_v48, %v2596_v6 }
  0x18   :  { %944 = vmatprep.subr.bf16.mxu0 %v2717_v43 }
  0x1a   :  { %978 = vmatpush1.bf16.msra.mxu1 %v2723_v44 }
  0x1b   :  { %979 = vmatprep.subr.bf16.mxu1 %v2730_v45  ;;  %945 = vmatpush1.bf16.msra.mxu0 %v2736_v46 }
  0x1c   :  { %946 = vmatprep.subr.bf16.mxu0 %v2742_v47 }
  0x1e   :  { %980 = vmatpush1.bf16.msra.mxu1 %v2751_v49 }
  0x1f   :  { %981 = vmatprep.subr.bf16.mxu1 %v2757_v50  ;;  %947 = vmatpush1.bf16.msra.mxu0 %v2763_v51 }
  0x20   :  { %948 = vmatprep.subr.bf16.mxu0 %v2769_v52 }
  0x22   :  { %982 = vmatpush1.bf16.msra.mxu1 %v2775_v53 }
  0x23   :  { %983 = vmatprep.subr.bf16.mxu1 %v2781_v54  ;;  %949 = vmatpush1.bf16.msra.mxu0 %v2787_v55 }
  0x24   :  { %1076 = vmatprep.subr.bf16.mxu0 %v2634_v24 }
  0x26   :  { %984 = vmatpush1.bf16.msra.mxu1 %v2794_v56  ;;  %967 = vmatmul.mubr.bf16.vlgmr.msra.gmra.mrb[0].mxu0 %v3433_v2 }
  0x27   :  { %985 = vmatprep.subr.bf16.mxu1 %v2800_v57  ;;  %1077 = vmatpush1.bf16.msra.mxu0 %v2639_v25 }
  0x28   :  { %1108 = vmatprep.mubr.bf16.mxu0 %v3433_v2  ;;  %1078 = vmatprep.subr.bf16.mxu0 %v2647_v29 }
  0x2a   :  { %986 = vmatpush1.bf16.msra.mxu1 %v2808_v58 }
  0x2b   :  { %987 = vmatprep.subr.bf16.mxu1 %v2814_v59  ;;  %1079 = vmatpush1.bf16.msra.mxu0 %v2653_v30 }
  0x2c   :  { %1080 = vmatprep.subr.bf16.mxu0 %v2662_v33 }
  0x2e   :  { %988 = vmatpush1.bf16.msra.mxu1 %v2824_v60 }
  0x2f   :  { %989 = vmatprep.subr.bf16.mxu1 %v2830_v61  ;;  %1081 = vmatpush1.bf16.msra.mxu0 %v2673_v36 }
  0x30   :  { %1082 = vmatprep.subr.bf16.mxu0 %v2680_v37 }
  0x32   :  { %990 = vmatpush1.bf16.msra.mxu1 %v2838_v62 }
  0x33   :  { %1117 = vmatprep.subr.bf16.mxu1 %v2667_v35  ;;  %1083 = vmatpush1.bf16.msra.mxu0 %v2688_v38 }
  0x34   :  { %1084 = vmatprep.subr.bf16.mxu0 %v2694_v39 }
  0x35   :  { %1008 = vmatmul.mubr.bf16.vlgmr.msra.gmra.mrb[8].mxu1 %v3433_v2 }
  0x36   :  { %1118 = vmatpush1.bf16.msra.mxu1 %v2699_v40  ;;  %1149 = vmatprep.mubr.bf16.mxu1 %v3433_v2 }
  0x37   :  { %1119 = vmatprep.subr.bf16.mxu1 %v2704_v41  ;;  %1085 = vmatpush1.bf16.msra.mxu0 %v2710_v42 }
  0x38   :  { %1086 = vmatprep.subr.bf16.mxu0 %v2717_v43 }
  0x3a   :  { %1120 = vmatpush1.bf16.msra.mxu1 %v2723_v44 }
  0x3b   :  { %1121 = vmatprep.subr.bf16.mxu1 %v2730_v45  ;;  %1087 = vmatpush1.bf16.msra.mxu0 %v2736_v46 }
  0x3c   :  { %1088 = vmatprep.subr.bf16.mxu0 %v2742_v47 }
  0x3e   :  { %1122 = vmatpush1.bf16.msra.mxu1 %v2751_v49 }
  0x3f   :  { %1123 = vmatprep.subr.bf16.mxu1 %v2757_v50  ;;  %1089 = vmatpush1.bf16.msra.mxu0 %v2763_v51 }
  0x40   :  { %1090 = vmatprep.subr.bf16.mxu0 %v2769_v52 }
  0x42   :  { %1124 = vmatpush1.bf16.msra.mxu1 %v2775_v53 }
  0x43   :  { %1125 = vmatprep.subr.bf16.mxu1 %v2781_v54  ;;  %1091 = vmatpush1.bf16.msra.mxu0 %v2787_v55 }
  0x44   :  { %1218 = vmatprep.subr.bf16.mxu0 %v2634_v24 }
  0x46   :  { %1126 = vmatpush1.bf16.msra.mxu1 %v2794_v56 }
  0x47   :  { %1127 = vmatprep.subr.bf16.mxu1 %v2800_v57 }
  0x4a   :  { %1128 = vmatpush1.bf16.msra.mxu1 %v2808_v58 }
  0x4b   :  { %1129 = vmatprep.subr.bf16.mxu1 %v2814_v59 }
  0x4e   :  { %1130 = vmatpush1.bf16.msra.mxu1 %v2824_v60 }
  0x4f   :  { %1131 = vmatprep.subr.bf16.mxu1 %v2830_v61 }
  0x52   :  { %1132 = vmatpush1.bf16.msra.mxu1 %v2838_v62 }
  0x53   :  { %1259 = vmatprep.subr.bf16.mxu1 %v2667_v35 }
  0xe0   :  { %v164_v5 = vpop.f32.mrb[0].mxu1 }
  0xe1   :  { %v165_v7 = vadd.f32 %v164_v5, %v89_v3  ;;  %v166_v8 = vpop.f32.mrb[1].mxu1 }
  0xe2   :  { %v167_v10 = vadd.f32 %v166_v8, %v93_v4  ;;  %v168_v11 = vpop.f32.mrb[2].mxu1 }
  0xe3   :  { %v2880_v13 = vadd.f32 %v168_v11, %v89_v3  ;;  %v170_v14 = vpop.f32.mrb[3].mxu1 }
  0xe4   :  { %v224_v15 = vcombine.low %v165_v7, %v167_v10  ;;  %v225_v16 = vcombine.high %v165_v7, %v167_v10  ;;  %v2882_v17 = vadd.f32 %v170_v14, %v93_v4 }
  0xe6   :  { %v234_v7 = vrot.slane %v224_v15, %v2624_v18  ;;  %v241_v8 = vrot.slane %v225_v16, %v2624_v18 }
  0xe8   :  { %v207_v27 = vpop.f32.mrb[4].mxu1 }
  0xe9   :  { %v208_v28 = vadd.f32 %v207_v27, %v97_v19  ;;  %v209_v31 = vpop.f32.mrb[5].mxu1 }
  0xea   :  { %v210_v32 = vadd.f32 %v209_v31, %v101_v22  ;;  %v211_v34 = vpop.f32.mrb[6].mxu1 }
  0xeb   :  { %v212_v63 = vadd.f32 %v211_v34, %v97_v19  ;;  %v213_v1 = vpop.f32.mrb[7].mxu1 }
  0xec   :  { %v226_v3 = vcombine.low %v208_v28, %v210_v32  ;;  %v227_v4 = vcombine.high %v208_v28, %v210_v32  ;;  %v214_v5 = vadd.f32 %v213_v1, %v101_v22 }
  0xee   :  { %v248_v9 = vrot.slane %v226_v3, %v2624_v18  ;;  %v255_v0 = vrot.slane %v227_v4, %v2624_v18  ;;  %v262_v10 = vcombine.low %v212_v63, %v214_v5  ;;  %v263_v11 = vcombine.high %v212_v63, %v214_v5 }
  0xf0   :  { %v256_v14 = vcombine.low %v234_v7, %v248_v9  ;;  %v257_v23 = vcombine.high %v234_v7, %v248_v9  ;;  %v258_v19 = vcombine.low %v241_v8, %v255_v0  ;;  %v259_v26 = vcombine.high %v241_v8, %v255_v0 }
  0xf1   :  { %v2189_v27 = vcombine.low %v248_v9, %v248_v9  ;;  %v2190_v28 = vcombine.high %v248_v9, %v248_v9  ;;  %v2191_v22 = vcombine.low %v255_v0, %v255_v0  ;;  %v2192_v31 = vcombine.high %v255_v0, %v255_v0 }
  0xf2   :  { %v303_v15 = vrot.slane %v256_v14, %v2624_v18  ;;  %v320_v16 = vrot.slane %v257_v23, %v2624_v18  ;;  %v337_v32 = vrot.slane %v258_v19, %v2624_v18  ;;  %v354_v34 = vrot.slane %v259_v26, %v2624_v18 }
  0xf3   :  { %v310_v63 = vrot.slane %v2189_v27, %v2624_v18  ;;  %v327_v6 = vrot.slane %v2190_v28, %v2624_v18  ;;  %v344_v48 = vrot.slane %v2191_v22, %v2624_v18  ;;  %v361_v1 = vrot.slane %v2192_v31, %v2624_v18 }
  0xf4   :  { %v311_v3 = vcombine.high %v303_v15, %v303_v15  ;;  %v328_v4 = vcombine.high %v320_v16, %v320_v16  ;;  %v345_v5 = vcombine.high %v337_v32, %v337_v32  ;;  %v362_v7 = vcombine.high %v354_v34, %v354_v34 }
  0xf5   :  { %v312_v8 = vcombine.high %v310_v63, %v310_v63  ;;  %v329_v9 = vcombine.high %v327_v6, %v327_v6  ;;  %v346_v0 = vcombine.high %v344_v48, %v344_v48  ;;  %v363_v14 = vcombine.high %v361_v1, %v361_v1 }
  0xf6   :  { %v2197_v23 = vpack.c.bf16 %v311_v3, %v303_v15  ;;  %v2199_v19 = vpack.c.bf16 %v328_v4, %v320_v16  ;;  %v2201_v2 = vpack.c.bf16 %v345_v5, %v337_v32  ;;  %v2203_v26 = vpack.c.bf16 %v362_v7, %v354_v34 }
  0xf7   :  { %v2198_v21 = vpack.c.bf16 %v312_v8, %v310_v63  ;;  %v2200_v27 = vpack.c.bf16 %v329_v9, %v327_v6  ;;  %v2202_v20 = vpack.c.bf16 %v346_v0, %v344_v48  ;;  %v2204_v28 = vpack.c.bf16 %v363_v14, %v361_v1 }
  0xf8   :  { %v536_v22 = vrot.slane %v2197_v23, %v2893_v12  ;;  %v560_v31 = vrot.slane %v2199_v19, %v2893_v12  ;;  %v584_v35 = vrot.slane %v2201_v2, %v2893_v12  ;;  %v608_v24 = vrot.slane %v2203_v26, %v2893_v12 }
  0xf9   :  { %v543_v62 = vrot.slane %v2198_v21, %v2893_v12  ;;  %v567_v55 = vrot.slane %v2200_v27, %v2893_v12  ;;  %v591_v15 = vrot.slane %v2202_v20, %v2893_v12  ;;  %v615_v16 = vrot.slane %v2204_v28, %v2893_v12  ;;  %v2921_v48 = vpop.f32.mrb[0].mxu0 }
  0xfa   :  { %v3447_v32 = vcombine.low %v2880_v13, %v2882_v17  ;;  %v3448_v63 = vcombine.high %v2880_v13, %v2882_v17  ;;  %v284_v6 = vrot.slane %v262_v10, %v2624_v18  ;;  %v291_v21 = vrot.slane %v263_v11, %v2624_v18  ;;  %v970_v5 = vpop.f32.mrb[1].mxu0 }
  0xfb   :  { %v544_v1 = vcombine.low %v536_v22, %v543_v62  ;;  %v568_v20 = vcombine.low %v560_v31, %v567_v55  ;;  %v592_v3 = vcombine.low %v584_v35, %v591_v15  ;;  %v616_v4 = vcombine.low %v608_v24, %v615_v16  ;;  %v972_v14 = vpop.f32.mrb[2].mxu0 }
  0xfc   :  { %v270_v34 = vrot.slane %v3447_v32, %v2624_v18  ;;  %v277_v2 = vrot.slane %v3448_v63, %v2624_v18  ;;  %v2193_v13 = vcombine.low %v284_v6, %v284_v6  ;;  %v2194_v17 = vcombine.high %v284_v6, %v284_v6  ;;  %v973_v23 = vpop.f32.mrb[3].mxu0 }
  0xfd   :  { %2213 = vst.sshfl [vmem:[#allocation2] sm:$0x55 pattern:$0x73625140] %v544_v1  ;;  %v2195_v10 = vcombine.low %v291_v21, %v291_v21  ;;  %v2196_v11 = vcombine.high %v291_v21, %v291_v21 }
  0xfe   :  { %v292_v7 = vcombine.low %v270_v34, %v284_v6  ;;  %v293_v8 = vcombine.high %v270_v34, %v284_v6  ;;  %v294_v9 = vcombine.low %v277_v2, %v291_v21  ;;  %v295_v0 = vcombine.high %v277_v2, %v291_v21  ;;  %2214 = vst.sshfl [vmem:[#allocation2 + $0x4] sm:$0x55 pattern:$0x73625140] %v568_v20 }
  0xff   :  { %2215 = vst.sshfl [vmem:[#allocation2 + $0x8] sm:$0x55 pattern:$0x73625140] %v592_v3  ;;  %v378_v19 = vrot.slane %v2193_v13, %v2624_v18  ;;  %v395_v26 = vrot.slane %v2194_v17, %v2624_v18  ;;  %v412_v27 = vrot.slane %v2195_v10, %v2624_v18  ;;  %v429_v28 = vrot.slane %v2196_v11, %v2624_v18 }
 0x100   :  { %2216 = vst.sshfl [vmem:[#allocation2 + $0xc] sm:$0x55 pattern:$0x73625140] %v616_v4  ;;  %v371_v62 = vrot.slane %v292_v7, %v2624_v18  ;;  %v388_v35 = vrot.slane %v293_v8, %v2624_v18  ;;  %v405_v24 = vrot.slane %v294_v9, %v2624_v18  ;;  %v422_v55 = vrot.slane %v295_v0, %v2624_v18 }
 0x101   :  { %v380_v32 = vcombine.high %v378_v19, %v378_v19  ;;  %v397_v34 = vcombine.high %v395_v26, %v395_v26  ;;  %v414_v63 = vcombine.high %v412_v27, %v412_v27  ;;  %v431_v2 = vcombine.high %v429_v28, %v429_v28 }
 0x102   :  { %v379_v22 = vcombine.high %v371_v62, %v371_v62  ;;  %v396_v31 = vcombine.high %v388_v35, %v388_v35  ;;  %v413_v15 = vcombine.high %v405_v24, %v405_v24  ;;  %v430_v16 = vcombine.high %v422_v55, %v422_v55 }
 0x103   :  { %v2206_v3 = vpack.c.bf16 %v380_v32, %v378_v19  ;;  %v2208_v4 = vpack.c.bf16 %v397_v34, %v395_v26  ;;  %v2210_v7 = vpack.c.bf16 %v414_v63, %v412_v27  ;;  %v2212_v8 = vpack.c.bf16 %v431_v2, %v429_v28 }
 0x104   :  { %v2205_v6 = vpack.c.bf16 %v379_v22, %v371_v62  ;;  %v2207_v21 = vpack.c.bf16 %v396_v31, %v388_v35  ;;  %v2209_v1 = vpack.c.bf16 %v413_v15, %v405_v24  ;;  %v2211_v20 = vpack.c.bf16 %v430_v16, %v422_v55 }
 0x105   :  { %v639_v17 = vrot.slane %v2206_v3, %v2893_v12  ;;  %v663_v10 = vrot.slane %v2208_v4, %v2893_v12  ;;  %v687_v11 = vrot.slane %v2210_v7, %v2893_v12  ;;  %v711_v23 = vrot.slane %v2212_v8, %v2893_v12  ;;  %v2941_v15 = vld [vmem:[#allocation2] sm:$0xff]  }
 0x106   :  { %v632_v9 = vrot.slane %v2205_v6, %v2893_v12  ;;  %v656_v0 = vrot.slane %v2207_v21, %v2893_v12  ;;  %v680_v14 = vrot.slane %v2209_v1, %v2893_v12  ;;  %v704_v13 = vrot.slane %v2211_v20, %v2893_v12 }
 0x107   :  { %v1020_v62 = vcombine.low %v2921_v48, %v970_v5  ;;  %v773_v48 = vunpack.c.l.bf16 %v2941_v15 }
 0x108   :  { %v640_v35 = vcombine.low %v632_v9, %v639_v17  ;;  %v664_v24 = vcombine.low %v656_v0, %v663_v10  ;;  %v688_v55 = vcombine.low %v680_v14, %v687_v11  ;;  %v712_v19 = vcombine.low %v704_v13, %v711_v23  ;;  %v1009_v26 = vpop.f32.mrb[8].mxu1 }
 0x109   :  { %v1011_v27 = vpop.f32.mrb[9].mxu1  ;;  %v1028_v28 = vrot.slane %v1020_v62, %v2624_v18 }
 0x10a   :  { %2217 = vst.sshfl [vmem:[#allocation2 + $0x10] sm:$0x55 pattern:$0x73625140] %v640_v35  ;;  %v1021_v22 = vcombine.low %v1009_v26, %v1011_v27  ;;  %v1013_v31 = vpop.f32.mrb[10].mxu1  ;;  %v3451_v26 = vld [vmem:[#allocation6_spill] sm:$0xff] }
 0x10b   :  { %2218 = vst.sshfl [vmem:[#allocation2 + $0x14] sm:$0x55 pattern:$0x73625140] %v664_v24  ;;  %v1014_v16 = vpop.f32.mrb[11].mxu1  ;;  %v3452_v27 = vld [vmem:[#allocation3_spill] sm:$0xff] }
 0x10c   :  { %2219 = vst.sshfl [vmem:[#allocation2 + $0x18] sm:$0x55 pattern:$0x73625140] %v688_v55  ;;  %v1035_v12 = vrot.slane %v1021_v22, %v2624_v18  ;;  %v3449_v55 = vmov 0  }
 0x10d   :  { %2220 = vst.sshfl [vmem:[#allocation2 + $0x1c] sm:$0x55 pattern:$0x73625140] %v712_v19  ;;  %v3450_v19 = vld [vmem:[#allocation5_spill] sm:$0xff] }
 0x10e   :  { %v1036_v5 = vcombine.low %v1028_v28, %v1035_v12  ;;  %v3453_v28 = vld [vmem:[#allocation4_spill] sm:$0xff] }
 0x110   :  { %v1038_v32 = vadd.f32 %v1036_v5, %v773_v48 }
 0x112   :  { %v2253_v34 = vmul.f32 -1.442695, %v1038_v32  ;;  %v1046_v63 = vrot.slane %v1038_v32, 2  ;;  %v1057_v6 = vrot.slane %v1038_v32, 6  ;;  %v1054_v20 = vrot.slane %v1038_v32, 4 }
 0x114   :  { %2383 = vpow2.f32 %v2253_v34  ;;  %v2254_v2 = vmul.f32 -1.442695, %v1046_v63  ;;  %v2255_v21 = vmul.f32 -1.442695, %v1057_v6 }
 0x116   :  { %2385 = vpow2.f32 %v2254_v2 }
 0x117   :  { %2387 = vpow2.f32 %v2255_v21 }
 0x11e   :  { %v2384_v1 = vpop.eup %2383 }
 0x11f   :  { %v1042_v3 = vadd.f32 1.0, %v2384_v1  ;;  %v1074_v1 = vunpack.c.h.bf16 %v2941_v15 }
 0x120   :  { %v2386_v4 = vpop.eup %2385 }
 0x121   :  { %2389 = vrcp.f32 %v1042_v3  ;;  %v1051_v7 = vadd.f32 1.0, %v2386_v4  ;;  %v2388_v8 = vpop.eup %2387 }
 0x122   :  { %2391 = vtanh.f32 %v1054_v20  ;;  %v1062_v13 = vadd.f32 1.0, %v2388_v8 }
 0x123   :  { %2393 = vrcp.f32 %v1051_v7 }
 0x124   :  { %2395 = vrcp.f32 %v1062_v13 }
 0x12b   :  { %v2390_v9 = vpop.eup %2389 }
 0x12c   :  { %v2392_v0 = vpop.eup %2391 }
 0x12d   :  { %v2394_v14 = vpop.eup %2393  ;;  %v1066_v10 = vmul.f32 %v2392_v0, %v2390_v9 }
 0x12e   :  { %v1065_v17 = vmul.f32 0.0, %v2394_v14  ;;  %v2396_v23 = vpop.eup %2395 }
 0x130   :  { %v2945_v11 = vadd.f32 %v1066_v10, %v1065_v17 }
 0x132   :  { %2397 = vtanh.f32 %v2945_v11 }
 0x13c   :  { %v2398_v62 = vpop.eup %2397 }
 0x13d   :  { %v2948_v35 = vmul.f32 %v2398_v62, %v2396_v23 }
 0x13f   :  { %v1075_v24 = vpack.c.bf16 %v2948_v35, %v2948_v35 }
 0x141   :  { %1109 = vmatmul.mubr.bf16.vlgmr.msra.gmra.mrb[4].mxu0 %v1075_v24  ;;  %1150 = vmatmul.mubr.bf16.vlgmr.msra.gmra.mrb[12].mxu1 %v1075_v24 }
 0x142   :  { %1219 = vmatpush1.bf16.msra.mxu0 %v2639_v25  ;;  %1260 = vmatpush1.bf16.msra.mxu1 %v2699_v40 }
 0x143   :  { %1220 = vmatprep.subr.bf16.mxu0 %v2647_v29  ;;  %1261 = vmatprep.subr.bf16.mxu1 %v2704_v41 }
 0x144   :  { %1250 = vmatprep.mubr.bf16.mxu0 %v3449_v55  ;;  %1291 = vmatprep.mubr.bf16.mxu1 %v3449_v55 }
 0x146   :  { %1221 = vmatpush1.bf16.msra.mxu0 %v2653_v30  ;;  %1262 = vmatpush1.bf16.msra.mxu1 %v2723_v44 }
 0x147   :  { %1222 = vmatprep.subr.bf16.mxu0 %v2662_v33  ;;  %1263 = vmatprep.subr.bf16.mxu1 %v2730_v45 }
 0x14a   :  { %1223 = vmatpush1.bf16.msra.mxu0 %v2673_v36  ;;  %1264 = vmatpush1.bf16.msra.mxu1 %v2751_v49 }
 0x14b   :  { %1224 = vmatprep.subr.bf16.mxu0 %v2680_v37  ;;  %1265 = vmatprep.subr.bf16.mxu1 %v2757_v50 }
 0x14e   :  { %1225 = vmatpush1.bf16.msra.mxu0 %v2688_v38  ;;  %1266 = vmatpush1.bf16.msra.mxu1 %v2775_v53 }
 0x14f   :  { %1226 = vmatprep.subr.bf16.mxu0 %v2694_v39  ;;  %1267 = vmatprep.subr.bf16.mxu1 %v2781_v54 }
 0x152   :  { %1227 = vmatpush1.bf16.msra.mxu0 %v2710_v42  ;;  %1268 = vmatpush1.bf16.msra.mxu1 %v2794_v56 }
 0x153   :  { %1228 = vmatprep.subr.bf16.mxu0 %v2717_v43  ;;  %1269 = vmatprep.subr.bf16.mxu1 %v2800_v57 }
 0x156   :  { %1229 = vmatpush1.bf16.msra.mxu0 %v2736_v46  ;;  %1270 = vmatpush1.bf16.msra.mxu1 %v2808_v58 }
 0x157   :  { %1230 = vmatprep.subr.bf16.mxu0 %v2742_v47  ;;  %1271 = vmatprep.subr.bf16.mxu1 %v2814_v59 }
 0x15a   :  { %1231 = vmatpush1.bf16.msra.mxu0 %v2763_v51  ;;  %1272 = vmatpush1.bf16.msra.mxu1 %v2824_v60 }
 0x15b   :  { %1232 = vmatprep.subr.bf16.mxu0 %v2769_v52  ;;  %1273 = vmatprep.subr.bf16.mxu1 %v2830_v61 }
 0x15e   :  { %1233 = vmatpush1.bf16.msra.mxu0 %v3450_v19  ;;  %1274 = vmatpush1.bf16.msra.mxu1 %v3451_v26 }
 0x15f   :  { %1360 = vmatprep.subr.bf16.mxu0 %v3452_v27  ;;  %1401 = vmatprep.subr.bf16.mxu1 %v3453_v28 }
 0x214   :  { %v1110_v22 = vpop.f32.mrb[4].mxu0  ;;  %v1151_v31 = vpop.f32.mrb[12].mxu1 }
 0x215   :  { %v1112_v16 = vpop.f32.mrb[5].mxu0  ;;  %v1153_v12 = vpop.f32.mrb[13].mxu1 }
 0x216   :  { %v1162_v48 = vcombine.low %v1110_v22, %v1112_v16  ;;  %v1163_v5 = vcombine.low %v1151_v31, %v1153_v12  ;;  %v1114_v32 = vpop.f32.mrb[6].mxu0  ;;  %v1155_v34 = vpop.f32.mrb[14].mxu1 }
 0x217   :  { %v1115_v63 = vpop.f32.mrb[7].mxu0  ;;  %v1156_v2 = vpop.f32.mrb[15].mxu1 }
 0x218   :  { %v1170_v6 = vrot.slane %v1162_v48, %v2624_v18  ;;  %v1177_v21 = vrot.slane %v1163_v5, %v2624_v18  ;;  %v2993_v5 = vpop.permute.xlu0 %770 }
 0x219   :  { %vm1070_vm1 = vcmp.eq.s32.totalorder %v2993_v5, 1  ;;  %vm1212_vm2 = vcmp.eq.s32.totalorder %v2993_v5, 2  ;;  %vm1354_vm3 = vcmp.eq.s32.totalorder %v2993_v5, 3  ;;  %vm1496_vm4 = vcmp.eq.s32.totalorder %v2993_v5, 4 }
 0x21a   :  { %v1178_v20 = vcombine.low %v1170_v6, %v1177_v21  ;;  %v1071_v2 = vsel %vm1070_vm1, %v2948_v35, 0.0  ;;  %vm1638_vm5 = vcmp.eq.s32.totalorder %v2993_v5, 5  ;;  %vm1780_vm6 = vcmp.eq.s32.totalorder %v2993_v5, 6 }
 0x21b   :  { %vm1922_vm7 = vcmp.eq.s32.totalorder %v2993_v5, 7  ;;  %vm2064_vm9 = vcmp.eq.s32.totalorder %v2993_v5, 8 }
 0x21c   :  { %v1180_v3 = vadd.f32 %v1178_v20, %v1074_v1 }
 0x21e   :  { %v2256_v4 = vmul.f32 -1.442695, %v1180_v3  ;;  %v1188_v7 = vrot.slane %v1180_v3, 2  ;;  %v1199_v9 = vrot.slane %v1180_v3, 6  ;;  %v1196_v13 = vrot.slane %v1180_v3, 4 }
 0x220   :  { %2399 = vpow2.f32 %v2256_v4  ;;  %v2257_v8 = vmul.f32 -1.442695, %v1188_v7  ;;  %v2258_v0 = vmul.f32 -1.442695, %v1199_v9  ;;  %v3034_v9 = vld [vmem:[#allocation2 + $0x8] sm:$0xff]  }
 0x222   :  { %2401 = vpow2.f32 %v2257_v8 }
 0x223   :  { %2403 = vpow2.f32 %v2258_v0 }
 0x22a   :  { %v2400_v14 = vpop.eup %2399 }
 0x22b   :  { %v1184_v17 = vadd.f32 1.0, %v2400_v14 }
 0x22c   :  { %v2402_v10 = vpop.eup %2401 }
 0x22d   :  { %2405 = vrcp.f32 %v1184_v17  ;;  %v1193_v23 = vadd.f32 1.0, %v2402_v10  ;;  %v2404_v62 = vpop.eup %2403 }
 0x22e   :  { %2407 = vtanh.f32 %v1196_v13  ;;  %v1204_v31 = vadd.f32 1.0, %v2404_v62 }
 0x22f   :  { %2409 = vrcp.f32 %v1193_v23 }
 0x230   :  { %2411 = vrcp.f32 %v1204_v31 }
 0x237   :  { %v2406_v15 = vpop.eup %2405 }
 0x238   :  { %v2408_v24 = vpop.eup %2407 }
 0x239   :  { %v2410_v22 = vpop.eup %2409  ;;  %v1208_v12 = vmul.f32 %v2408_v24, %v2406_v15 }
 0x23a   :  { %v1207_v16 = vmul.f32 %v2410_v22, %v2945_v11  ;;  %v2412_v32 = vpop.eup %2411 }
 0x23c   :  { %v2990_v48 = vadd.f32 %v1208_v12, %v1207_v16 }
 0x23e   :  { %2413 = vtanh.f32 %v2990_v48 }
 0x248   :  { %v2414_v34 = vpop.eup %2413 }
 0x249   :  { %v1211_v63 = vmul.f32 %v2414_v34, %v2412_v32 }
 0x24b   :  { %v2998_v6 = vsel %vm1212_vm2, %v1211_v63, %v1071_v2  ;;  %v1217_v11 = vpack.c.bf16 %v1211_v63, %v1211_v63 }
 0x24d   :  { %1251 = vmatmul.mubr.bf16.vlgmr.msra.gmra.mrb[8].mxu0 %v1217_v11  ;;  %1292 = vmatmul.mubr.bf16.vlgmr.msra.gmra.mrb[16].mxu1 %v1217_v11 }
 0x24e   :  { %1361 = vmatpush1.bf16.msra.mxu0 %v2639_v25  ;;  %1402 = vmatpush1.bf16.msra.mxu1 %v2699_v40 }
 0x24f   :  { %1362 = vmatprep.subr.bf16.mxu0 %v2647_v29  ;;  %1403 = vmatprep.subr.bf16.mxu1 %v2704_v41 }
 0x250   :  { %1392 = vmatprep.mubr.bf16.mxu0 %v3449_v55  ;;  %1433 = vmatprep.mubr.bf16.mxu1 %v3449_v55 }
 0x252   :  { %1363 = vmatpush1.bf16.msra.mxu0 %v2653_v30  ;;  %1404 = vmatpush1.bf16.msra.mxu1 %v2723_v44 }
 0x253   :  { %1364 = vmatprep.subr.bf16.mxu0 %v2662_v33  ;;  %1405 = vmatprep.subr.bf16.mxu1 %v2730_v45 }
 0x256   :  { %1365 = vmatpush1.bf16.msra.mxu0 %v2673_v36  ;;  %1406 = vmatpush1.bf16.msra.mxu1 %v2751_v49 }
 0x257   :  { %1366 = vmatprep.subr.bf16.mxu0 %v2680_v37  ;;  %1407 = vmatprep.subr.bf16.mxu1 %v2757_v50 }
 0x25a   :  { %1367 = vmatpush1.bf16.msra.mxu0 %v2688_v38  ;;  %1408 = vmatpush1.bf16.msra.mxu1 %v2775_v53 }
 0x25b   :  { %1368 = vmatprep.subr.bf16.mxu0 %v2694_v39  ;;  %1409 = vmatprep.subr.bf16.mxu1 %v2781_v54 }
 0x25e   :  { %1369 = vmatpush1.bf16.msra.mxu0 %v2710_v42  ;;  %1410 = vmatpush1.bf16.msra.mxu1 %v2794_v56 }
 0x25f   :  { %1370 = vmatprep.subr.bf16.mxu0 %v2717_v43  ;;  %1411 = vmatprep.subr.bf16.mxu1 %v2800_v57 }
 0x262   :  { %1371 = vmatpush1.bf16.msra.mxu0 %v2736_v46  ;;  %1412 = vmatpush1.bf16.msra.mxu1 %v2808_v58 }
 0x263   :  { %1372 = vmatprep.subr.bf16.mxu0 %v2742_v47  ;;  %1413 = vmatprep.subr.bf16.mxu1 %v2814_v59 }
 0x266   :  { %1373 = vmatpush1.bf16.msra.mxu0 %v2763_v51  ;;  %1414 = vmatpush1.bf16.msra.mxu1 %v2824_v60 }
 0x267   :  { %1374 = vmatprep.subr.bf16.mxu0 %v2769_v52  ;;  %1415 = vmatprep.subr.bf16.mxu1 %v2830_v61 }
 0x26a   :  { %1375 = vmatpush1.bf16.msra.mxu0 %v3450_v19  ;;  %1416 = vmatpush1.bf16.msra.mxu1 %v3451_v26 }
 0x26b   :  { %1502 = vmatprep.subr.bf16.mxu0 %v3452_v27  ;;  %1543 = vmatprep.subr.bf16.mxu1 %v3453_v28  ;;  %v1216_v27 = vunpack.c.l.bf16 %v3034_v9 }
 0x320   :  { %v1252_v35 = vpop.f32.mrb[8].mxu0  ;;  %v1293_v21 = vpop.f32.mrb[16].mxu1 }
 0x321   :  { %v1254_v1 = vpop.f32.mrb[9].mxu0  ;;  %v1295_v20 = vpop.f32.mrb[17].mxu1 }
 0x322   :  { %v1304_v3 = vcombine.low %v1252_v35, %v1254_v1  ;;  %v1305_v4 = vcombine.low %v1293_v21, %v1295_v20  ;;  %v1256_v7 = vpop.f32.mrb[10].mxu0  ;;  %v1297_v8 = vpop.f32.mrb[18].mxu1 }
 0x323   :  { %v1257_v0 = vpop.f32.mrb[11].mxu0  ;;  %v1298_v14 = vpop.f32.mrb[19].mxu1 }
 0x324   :  { %v1312_v13 = vrot.slane %v1304_v3, %v2624_v18  ;;  %v1319_v17 = vrot.slane %v1305_v4, %v2624_v18 }
 0x326   :  { %v1320_v10 = vcombine.low %v1312_v13, %v1319_v17 }
 0x328   :  { %v1322_v28 = vadd.f32 %v1320_v10, %v1216_v27 }
 0x32a   :  { %v2259_v23 = vmul.f32 -1.442695, %v1322_v28  ;;  %v1330_v62 = vrot.slane %v1322_v28, 2  ;;  %v1341_v24 = vrot.slane %v1322_v28, 6  ;;  %v1338_v16 = vrot.slane %v1322_v28, 4 }
 0x32c   :  { %2415 = vpow2.f32 %v2259_v23  ;;  %v2260_v15 = vmul.f32 -1.442695, %v1330_v62  ;;  %v2261_v22 = vmul.f32 -1.442695, %v1341_v24 }
 0x32e   :  { %2417 = vpow2.f32 %v2260_v15 }
 0x32f   :  { %2419 = vpow2.f32 %v2261_v22 }
 0x336   :  { %v2416_v31 = vpop.eup %2415 }
 0x337   :  { %v1326_v12 = vadd.f32 1.0, %v2416_v31  ;;  %v3105_v31 = vld [vmem:[%s3427_s3] ss:$16 sps:$4 sm:$0xff]  }
 0x338   :  { %v2418_v32 = vpop.eup %2417 }
 0x339   :  { %2421 = vrcp.f32 %v1326_v12  ;;  %v1335_v34 = vadd.f32 1.0, %v2418_v32  ;;  %v2420_v63 = vpop.eup %2419  ;;  %v3117_v12 = vld [vmem:[%s3427_s3 + $0x24] ss:$16 sps:$4 sm:$0xff]   ;;  %v3123_v32 = vld [vmem:[%s3427_s3 + $0x2c] ss:$16 sps:$4 sm:$0xff]  }
 0x33a   :  { %2423 = vtanh.f32 %v1338_v16  ;;  %v1346_v21 = vadd.f32 1.0, %v2420_v63  ;;  %v3111_v16 = vld [vmem:[%s3427_s3 + $0x8] ss:$16 sps:$4 sm:$0xff]  }
 0x33b   :  { %2425 = vrcp.f32 %v1335_v34  ;;  %v3131_v34 = vld [vmem:[%s3427_s3 + $0x20] ss:$16 sps:$4 sm:$0xff]   ;;  %v3137_v63 = vld [vmem:[%s3427_s3 + $0x28] ss:$16 sps:$4 sm:$0xff]  }
 0x33c   :  { %2427 = vrcp.f32 %v1346_v21  ;;  %v3161_v21 = vld [vmem:[%s3427_s3 + $0x48] ss:$16 sps:$4 sm:$0xff]  }
 0x343   :  { %v2422_v2 = vpop.eup %2421 }
 0x344   :  { %v2424_v11 = vpop.eup %2423 }
 0x345   :  { %v2426_v35 = vpop.eup %2425  ;;  %v1350_v20 = vmul.f32 %v2424_v11, %v2422_v2  ;;  %v3143_v2 = vld [vmem:[%s3427_s3 + $0x44] ss:$16 sps:$4 sm:$0xff]   ;;  %v3149_v11 = vld [vmem:[%s3427_s3 + $0x4c] ss:$16 sps:$4 sm:$0xff]  }
 0x346   :  { %v1349_v1 = vmul.f32 %v2426_v35, %v2990_v48  ;;  %v2428_v4 = vpop.eup %2427  ;;  %v3155_v35 = vld [vmem:[%s3427_s3 + $0x40] ss:$16 sps:$4 sm:$0xff]  }
 0x348   :  { %v3040_v3 = vadd.f32 %v1350_v20, %v1349_v1  ;;  %v3167_v1 = vld [vmem:[%s3427_s3 + $0x64] ss:$16 sps:$4 sm:$0xff]   ;;  %v3173_v20 = vld [vmem:[%s3427_s3 + $0x6c] ss:$16 sps:$4 sm:$0xff]  }
 0x34a   :  { %2429 = vtanh.f32 %v3040_v3 }
 0x354   :  { %v2430_v7 = vpop.eup %2429 }
 0x355   :  { %v1353_v8 = vmul.f32 %v2430_v7, %v2428_v4  ;;  %v3185_v4 = vld [vmem:[%s3427_s3 + $0x68] ss:$16 sps:$4 sm:$0xff]   ;;  %v3191_v7 = vld [vmem:[%s3427_s3 + $0x84] ss:$16 sps:$4 sm:$0xff]  }
 0x357   :  { %v3045_v0 = vsel %vm1354_vm3, %v1353_v8, %v2998_v6  ;;  %v1359_v14 = vpack.c.bf16 %v1353_v8, %v1353_v8  ;;  %v3197_v8 = vld [vmem:[%s3427_s3 + $0x8c] ss:$16 sps:$4 sm:$0xff]  }
 0x359   :  { %1393 = vmatmul.mubr.bf16.vlgmr.msra.gmra.mrb[12].mxu0 %v1359_v14  ;;  %1434 = vmatmul.mubr.bf16.vlgmr.msra.gmra.mrb[20].mxu1 %v1359_v14  ;;  %v3209_v14 = vld [vmem:[%s3427_s3 + $0x88] ss:$16 sps:$4 sm:$0xff]  }
 0x35a   :  { %1503 = vmatpush1.bf16.msra.mxu0 %v2639_v25  ;;  %1544 = vmatpush1.bf16.msra.mxu1 %v2699_v40  ;;  %v3082_v25 = vld [vmem:[%s3427_s3 + $0x4] ss:$16 sps:$4 sm:$0xff]  }
 0x35b   :  { %1504 = vmatprep.subr.bf16.mxu0 %v2647_v29  ;;  %1545 = vmatprep.subr.bf16.mxu1 %v2704_v41  ;;  %v3088_v29 = vld [vmem:[%s3427_s3 + $0xc] ss:$16 sps:$4 sm:$0xff]  }
 0x35c   :  { %1534 = vmatprep.mubr.bf16.mxu0 %v3449_v55  ;;  %1575 = vmatprep.mubr.bf16.mxu1 %v3449_v55 }
 0x35e   :  { %1505 = vmatpush1.bf16.msra.mxu0 %v2653_v30  ;;  %1546 = vmatpush1.bf16.msra.mxu1 %v2723_v44 }
 0x35f   :  { %1506 = vmatprep.subr.bf16.mxu0 %v2662_v33  ;;  %1547 = vmatprep.subr.bf16.mxu1 %v2730_v45 }
 0x362   :  { %1507 = vmatpush1.bf16.msra.mxu0 %v2673_v36  ;;  %1548 = vmatpush1.bf16.msra.mxu1 %v2751_v49 }
 0x363   :  { %1508 = vmatprep.subr.bf16.mxu0 %v2680_v37  ;;  %1549 = vmatprep.subr.bf16.mxu1 %v2757_v50 }
 0x366   :  { %1509 = vmatpush1.bf16.msra.mxu0 %v2688_v38  ;;  %1550 = vmatpush1.bf16.msra.mxu1 %v2775_v53 }
 0x367   :  { %1510 = vmatprep.subr.bf16.mxu0 %v2694_v39  ;;  %1551 = vmatprep.subr.bf16.mxu1 %v2781_v54 }
 0x36a   :  { %1511 = vmatpush1.bf16.msra.mxu0 %v2710_v42  ;;  %1552 = vmatpush1.bf16.msra.mxu1 %v2794_v56 }
 0x36b   :  { %1512 = vmatprep.subr.bf16.mxu0 %v2717_v43  ;;  %1553 = vmatprep.subr.bf16.mxu1 %v2800_v57 }
 0x36e   :  { %1513 = vmatpush1.bf16.msra.mxu0 %v2736_v46  ;;  %1554 = vmatpush1.bf16.msra.mxu1 %v2808_v58  ;;  %v1358_v46 = vunpack.c.h.bf16 %v3034_v9 }
 0x36f   :  { %1514 = vmatprep.subr.bf16.mxu0 %v2742_v47  ;;  %1555 = vmatprep.subr.bf16.mxu1 %v2814_v59 }
 0x372   :  { %1515 = vmatpush1.bf16.msra.mxu0 %v2763_v51  ;;  %1556 = vmatpush1.bf16.msra.mxu1 %v2824_v60 }
 0x373   :  { %1516 = vmatprep.subr.bf16.mxu0 %v2769_v52  ;;  %1557 = vmatprep.subr.bf16.mxu1 %v2830_v61 }
 0x376   :  { %1517 = vmatpush1.bf16.msra.mxu0 %v3450_v19  ;;  %1558 = vmatpush1.bf16.msra.mxu1 %v3451_v26 }
 0x377   :  { %1644 = vmatprep.subr.bf16.mxu0 %v3082_v25  ;;  %1685 = vmatprep.subr.bf16.mxu1 %v3088_v29 }
 0x42c   :  { %v1394_v30 = vpop.f32.mrb[12].mxu0  ;;  %v1435_v33 = vpop.f32.mrb[20].mxu1 }
 0x42d   :  { %v1396_v36 = vpop.f32.mrb[13].mxu0  ;;  %v1437_v37 = vpop.f32.mrb[21].mxu1 }
 0x42e   :  { %v1446_v38 = vcombine.low %v1394_v30, %v1396_v36  ;;  %v1447_v39 = vcombine.low %v1435_v33, %v1437_v37  ;;  %v1398_v40 = vpop.f32.mrb[14].mxu0  ;;  %v1439_v41 = vpop.f32.mrb[22].mxu1  ;;  %v3215_v30 = vld [vmem:[%s3427_s3 + $0xa4] ss:$16 sps:$4 sm:$0xff]   ;;  %v3221_v33 = vld [vmem:[%s3427_s3 + $0xac] ss:$16 sps:$4 sm:$0xff]  }
 0x42f   :  { %v1399_v42 = vpop.f32.mrb[15].mxu0  ;;  %v1440_v43 = vpop.f32.mrb[23].mxu1  ;;  %v3227_v36 = vld [vmem:[%s3427_s3 + $0xa0] ss:$16 sps:$4 sm:$0xff]   ;;  %v3233_v37 = vld [vmem:[%s3427_s3 + $0xa8] ss:$16 sps:$4 sm:$0xff]  }
 0x430   :  { %v1454_v44 = vrot.slane %v1446_v38, %v2624_v18  ;;  %v1461_v45 = vrot.slane %v1447_v39, %v2624_v18  ;;  %v3239_v38 = vld [vmem:[%s3427_s3 + $0xc4] ss:$16 sps:$4 sm:$0xff]   ;;  %v3245_v39 = vld [vmem:[%s3427_s3 + $0xcc] ss:$16 sps:$4 sm:$0xff]   ;;  %v3251_v40 = vld [vmem:[%s3427_s3 + $0xc0] ss:$16 sps:$4 sm:$0xff]  }
 0x431   :  { %v3258_v41 = vld [vmem:[%s3427_s3 + $0xe4] ss:$16 sps:$4 sm:$0xff]   ;;  %v3265_v42 = vld [vmem:[%s3427_s3 + $0xe0] ss:$16 sps:$4 sm:$0xff]  }
 0x432   :  { %v1462_v47 = vcombine.low %v1454_v44, %v1461_v45 }
 0x434   :  { %v1464_v49 = vadd.f32 %v1462_v47, %v1358_v46 }
 0x436   :  { %v2262_v50 = vmul.f32 -1.442695, %v1464_v49  ;;  %v1472_v51 = vrot.slane %v1464_v49, 2  ;;  %v1483_v53 = vrot.slane %v1464_v49, 6  ;;  %v1480_v57 = vrot.slane %v1464_v49, 4 }
 0x438   :  { %2431 = vpow2.f32 %v2262_v50  ;;  %v2263_v52 = vmul.f32 -1.442695, %v1472_v51  ;;  %v2264_v54 = vmul.f32 -1.442695, %v1483_v53  ;;  %v3271_v50 = vld [vmem:[#allocation2 + $0x10] sm:$0xff]  }
 0x43a   :  { %2433 = vpow2.f32 %v2263_v52 }
 0x43b   :  { %2435 = vpow2.f32 %v2264_v54  ;;  %v1500_v54 = vunpack.c.l.bf16 %v3271_v50 }
 0x442   :  { %v2432_v56 = vpop.eup %2431 }
 0x443   :  { %v1468_v58 = vadd.f32 1.0, %v2432_v56 }
 0x444   :  { %v2434_v59 = vpop.eup %2433 }
 0x445   :  { %2437 = vrcp.f32 %v1468_v58  ;;  %v1477_v19 = vadd.f32 1.0, %v2434_v59  ;;  %v2436_v48 = vpop.eup %2435 }
 0x446   :  { %2439 = vtanh.f32 %v1480_v57  ;;  %v1488_v17 = vadd.f32 1.0, %v2436_v48 }
 0x447   :  { %2441 = vrcp.f32 %v1477_v19 }
 0x448   :  { %2443 = vrcp.f32 %v1488_v17 }
 0x44f   :  { %v2438_v6 = vpop.eup %2437 }
 0x450   :  { %v2440_v9 = vpop.eup %2439 }
 0x451   :  { %v2442_v13 = vpop.eup %2441  ;;  %v1492_v10 = vmul.f32 %v2440_v9, %v2438_v6 }
 0x452   :  { %v1491_v27 = vmul.f32 %v2442_v13, %v3040_v3  ;;  %v2444_v23 = vpop.eup %2443  ;;  %v3179_v3 = vld [vmem:[%s3427_s3 + $0x60] ss:$16 sps:$4 sm:$0xff]  }
 0x454   :  { %v3095_v28 = vadd.f32 %v1492_v10, %v1491_v27 }
 0x456   :  { %2445 = vtanh.f32 %v3095_v28 }
 0x460   :  { %v2446_v62 = vpop.eup %2445 }
 0x461   :  { %v1495_v15 = vmul.f32 %v2446_v62, %v2444_v23 }
 0x463   :  { %v3100_v24 = vsel %vm1496_vm4, %v1495_v15, %v3045_v0  ;;  %v1501_v22 = vpack.c.bf16 %v1495_v15, %v1495_v15  ;;  %v3203_v0 = vld [vmem:[%s3427_s3 + $0x80] ss:$16 sps:$4 sm:$0xff]  }
 0x465   :  { %1535 = vmatmul.mubr.bf16.vlgmr.msra.gmra.mrb[16].mxu0 %v1501_v22  ;;  %1576 = vmatmul.mubr.bf16.vlgmr.msra.gmra.mrb[24].mxu1 %v1501_v22 }
 0x466   :  { %1645 = vmatpush1.bf16.msra.mxu0 %v3105_v31  ;;  %1686 = vmatpush1.bf16.msra.mxu1 %v3111_v16 }
 0x467   :  { %1646 = vmatprep.subr.bf16.mxu0 %v3117_v12  ;;  %1687 = vmatprep.subr.bf16.mxu1 %v3123_v32 }
 0x468   :  { %1676 = vmatprep.mubr.bf16.mxu0 %v3449_v55  ;;  %1717 = vmatprep.mubr.bf16.mxu1 %v3449_v55 }
 0x46a   :  { %1647 = vmatpush1.bf16.msra.mxu0 %v3131_v34  ;;  %1688 = vmatpush1.bf16.msra.mxu1 %v3137_v63 }
 0x46b   :  { %1648 = vmatprep.subr.bf16.mxu0 %v3143_v2  ;;  %1689 = vmatprep.subr.bf16.mxu1 %v3149_v11 }
 0x46e   :  { %1649 = vmatpush1.bf16.msra.mxu0 %v3155_v35  ;;  %1690 = vmatpush1.bf16.msra.mxu1 %v3161_v21 }
 0x46f   :  { %1650 = vmatprep.subr.bf16.mxu0 %v3167_v1  ;;  %1691 = vmatprep.subr.bf16.mxu1 %v3173_v20 }
 0x472   :  { %1651 = vmatpush1.bf16.msra.mxu0 %v3179_v3  ;;  %1692 = vmatpush1.bf16.msra.mxu1 %v3185_v4 }
 0x473   :  { %1652 = vmatprep.subr.bf16.mxu0 %v3191_v7  ;;  %1693 = vmatprep.subr.bf16.mxu1 %v3197_v8 }
 0x476   :  { %1653 = vmatpush1.bf16.msra.mxu0 %v3203_v0  ;;  %1694 = vmatpush1.bf16.msra.mxu1 %v3209_v14 }
 0x477   :  { %1654 = vmatprep.subr.bf16.mxu0 %v3215_v30  ;;  %1695 = vmatprep.subr.bf16.mxu1 %v3221_v33 }
 0x47a   :  { %1655 = vmatpush1.bf16.msra.mxu0 %v3227_v36  ;;  %1696 = vmatpush1.bf16.msra.mxu1 %v3233_v37 }
 0x47b   :  { %1656 = vmatprep.subr.bf16.mxu0 %v3239_v38  ;;  %1697 = vmatprep.subr.bf16.mxu1 %v3245_v39 }
 0x47e   :  { %1657 = vmatpush1.bf16.msra.mxu0 %v3251_v40  ;;  %1698 = vmatpush1.bf16.msra.mxu1 %v2824_v60 }
 0x47f   :  { %1658 = vmatprep.subr.bf16.mxu0 %v3258_v41  ;;  %1699 = vmatprep.subr.bf16.mxu1 %v2830_v61 }
 0x482   :  { %1659 = vmatpush1.bf16.msra.mxu0 %v3265_v42  ;;  %1700 = vmatpush1.bf16.msra.mxu1 %v3451_v26 }
 0x483   :  { %1786 = vmatprep.subr.bf16.mxu0 %v3082_v25  ;;  %1827 = vmatprep.subr.bf16.mxu1 %v3088_v29 }
 0x538   :  { %v1536_v60 = vpop.f32.mrb[16].mxu0  ;;  %v1577_v43 = vpop.f32.mrb[24].mxu1 }
 0x539   :  { %v1538_v44 = vpop.f32.mrb[17].mxu0  ;;  %v1579_v45 = vpop.f32.mrb[25].mxu1 }
 0x53a   :  { %v1588_v46 = vcombine.low %v1536_v60, %v1538_v44  ;;  %v1589_v47 = vcombine.low %v1577_v43, %v1579_v45  ;;  %v1540_v61 = vpop.f32.mrb[18].mxu0  ;;  %v1581_v49 = vpop.f32.mrb[26].mxu1 }
 0x53b   :  { %v1541_v51 = vpop.f32.mrb[19].mxu0  ;;  %v1582_v52 = vpop.f32.mrb[27].mxu1 }
 0x53c   :  { %v1596_v53 = vrot.slane %v1588_v46, %v2624_v18  ;;  %v1603_v26 = vrot.slane %v1589_v47, %v2624_v18  ;;  %v3328_v52 = vld [vmem:[%s3427_s3 + $0xe8] ss:$16 sps:$4 sm:$0xff]  }
 0x53e   :  { %v1604_v56 = vcombine.low %v1596_v53, %v1603_v26 }
 0x540   :  { %v1606_v57 = vadd.f32 %v1604_v56, %v1500_v54 }
 0x542   :  { %v2265_v58 = vmul.f32 -1.442695, %v1606_v57  ;;  %v1614_v59 = vrot.slane %v1606_v57, 2  ;;  %v1625_v48 = vrot.slane %v1606_v57, 6  ;;  %v1622_v13 = vrot.slane %v1606_v57, 4 }
 0x544   :  { %2447 = vpow2.f32 %v2265_v58  ;;  %v2266_v19 = vmul.f32 -1.442695, %v1614_v59  ;;  %v2267_v6 = vmul.f32 -1.442695, %v1625_v48 }
 0x546   :  { %2449 = vpow2.f32 %v2266_v19 }
 0x547   :  { %2451 = vpow2.f32 %v2267_v6 }
 0x54e   :  { %v2448_v9 = vpop.eup %2447 }
 0x54f   :  { %v1610_v17 = vadd.f32 1.0, %v2448_v9 }
 0x550   :  { %v2450_v27 = vpop.eup %2449 }
 0x551   :  { %2453 = vrcp.f32 %v1610_v17  ;;  %v1619_v10 = vadd.f32 1.0, %v2450_v27  ;;  %v2452_v23 = vpop.eup %2451  ;;  %v1642_v17 = vunpack.c.h.bf16 %v3271_v50 }
 0x552   :  { %2455 = vtanh.f32 %v1622_v13  ;;  %v1630_v60 = vadd.f32 1.0, %v2452_v23 }
 0x553   :  { %2457 = vrcp.f32 %v1619_v10 }
 0x554   :  { %2459 = vrcp.f32 %v1630_v60 }
 0x55b   :  { %v2454_v62 = vpop.eup %2453 }
 0x55c   :  { %v2456_v15 = vpop.eup %2455 }
 0x55d   :  { %v2458_v22 = vpop.eup %2457  ;;  %v1634_v44 = vmul.f32 %v2456_v15, %v2454_v62 }
 0x55e   :  { %v1633_v43 = vmul.f32 %v2458_v22, %v3095_v28  ;;  %v2460_v46 = vpop.eup %2459  ;;  %v3314_v28 = vld [vmem:[%s3427_s3 + $0xc8] ss:$16 sps:$4 sm:$0xff]  }
 0x560   :  { %v3277_v45 = vadd.f32 %v1634_v44, %v1633_v43 }
 0x562   :  { %2461 = vtanh.f32 %v3277_v45 }
 0x56c   :  { %v2462_v47 = vpop.eup %2461 }
 0x56d   :  { %v1637_v61 = vmul.f32 %v2462_v47, %v2460_v46 }
 0x56f   :  { %v3282_v49 = vsel %vm1638_vm5, %v1637_v61, %v3100_v24  ;;  %v1643_v51 = vpack.c.bf16 %v1637_v61, %v1637_v61  ;;  %v3321_v24 = vld [vmem:[%s3427_s3 + $0xec] ss:$16 sps:$4 sm:$0xff]  }
 0x571   :  { %1677 = vmatmul.mubr.bf16.vlgmr.msra.gmra.mrb[20].mxu0 %v1643_v51  ;;  %1718 = vmatmul.mubr.bf16.vlgmr.msra.gmra.mrb[28].mxu1 %v1643_v51 }
 0x572   :  { %1787 = vmatpush1.bf16.msra.mxu0 %v3105_v31  ;;  %1828 = vmatpush1.bf16.msra.mxu1 %v3111_v16 }
 0x573   :  { %1788 = vmatprep.subr.bf16.mxu0 %v3117_v12  ;;  %1829 = vmatprep.subr.bf16.mxu1 %v3123_v32 }
 0x574   :  { %1818 = vmatprep.mubr.bf16.mxu0 %v3449_v55  ;;  %1859 = vmatprep.mubr.bf16.mxu1 %v3449_v55 }
 0x576   :  { %1789 = vmatpush1.bf16.msra.mxu0 %v3131_v34  ;;  %1830 = vmatpush1.bf16.msra.mxu1 %v3137_v63 }
 0x577   :  { %1790 = vmatprep.subr.bf16.mxu0 %v3143_v2  ;;  %1831 = vmatprep.subr.bf16.mxu1 %v3149_v11 }
 0x57a   :  { %1791 = vmatpush1.bf16.msra.mxu0 %v3155_v35  ;;  %1832 = vmatpush1.bf16.msra.mxu1 %v3161_v21 }
 0x57b   :  { %1792 = vmatprep.subr.bf16.mxu0 %v3167_v1  ;;  %1833 = vmatprep.subr.bf16.mxu1 %v3173_v20 }
 0x57e   :  { %1793 = vmatpush1.bf16.msra.mxu0 %v3179_v3  ;;  %1834 = vmatpush1.bf16.msra.mxu1 %v3185_v4 }
 0x57f   :  { %1794 = vmatprep.subr.bf16.mxu0 %v3191_v7  ;;  %1835 = vmatprep.subr.bf16.mxu1 %v3197_v8 }
 0x582   :  { %1795 = vmatpush1.bf16.msra.mxu0 %v3203_v0  ;;  %1836 = vmatpush1.bf16.msra.mxu1 %v3209_v14 }
 0x583   :  { %1796 = vmatprep.subr.bf16.mxu0 %v3215_v30  ;;  %1837 = vmatprep.subr.bf16.mxu1 %v3221_v33 }
 0x586   :  { %1797 = vmatpush1.bf16.msra.mxu0 %v3227_v36  ;;  %1838 = vmatpush1.bf16.msra.mxu1 %v3233_v37 }
 0x587   :  { %1798 = vmatprep.subr.bf16.mxu0 %v3239_v38  ;;  %1839 = vmatprep.subr.bf16.mxu1 %v3245_v39 }
 0x58a   :  { %1799 = vmatpush1.bf16.msra.mxu0 %v3251_v40  ;;  %1840 = vmatpush1.bf16.msra.mxu1 %v3314_v28 }
 0x58b   :  { %1800 = vmatprep.subr.bf16.mxu0 %v3258_v41  ;;  %1841 = vmatprep.subr.bf16.mxu1 %v3321_v24 }
 0x58e   :  { %1801 = vmatpush1.bf16.msra.mxu0 %v3265_v42  ;;  %1842 = vmatpush1.bf16.msra.mxu1 %v3328_v52 }
 0x58f   :  { %1928 = vmatprep.subr.bf16.mxu0 %v3082_v25  ;;  %1969 = vmatprep.subr.bf16.mxu1 %v3088_v29 }
 0x644   :  { %v1678_v53 = vpop.f32.mrb[20].mxu0  ;;  %v1719_v26 = vpop.f32.mrb[28].mxu1 }
 0x645   :  { %v1680_v54 = vpop.f32.mrb[21].mxu0  ;;  %v1721_v56 = vpop.f32.mrb[29].mxu1 }
 0x646   :  { %v1730_v57 = vcombine.low %v1678_v53, %v1680_v54  ;;  %v1731_v58 = vcombine.low %v1719_v26, %v1721_v56  ;;  %v1682_v59 = vpop.f32.mrb[22].mxu0  ;;  %v1723_v19 = vpop.f32.mrb[30].mxu1 }
 0x647   :  { %v1683_v48 = vpop.f32.mrb[23].mxu0  ;;  %v1724_v6 = vpop.f32.mrb[31].mxu1 }
 0x648   :  { %v1738_v9 = vrot.slane %v1730_v57, %v2624_v18  ;;  %v1745_v13 = vrot.slane %v1731_v58, %v2624_v18 }
 0x64a   :  { %v1746_v27 = vcombine.low %v1738_v9, %v1745_v13 }
 0x64c   :  { %v1748_v25 = vadd.f32 %v1746_v27, %v1642_v17 }
 0x64e   :  { %v2268_v10 = vmul.f32 -1.442695, %v1748_v25  ;;  %v1756_v29 = vrot.slane %v1748_v25, 2  ;;  %v1767_v62 = vrot.slane %v1748_v25, 6  ;;  %v1764_v60 = vrot.slane %v1748_v25, 4 }
 0x650   :  { %2463 = vpow2.f32 %v2268_v10  ;;  %v2269_v23 = vmul.f32 -1.442695, %v1756_v29  ;;  %v2270_v15 = vmul.f32 -1.442695, %v1767_v62  ;;  %v2546_v10 = vmov 0.0   ;;  %v2375_v29 = vld [vmem:[%s3430_s5] sm:$0xff]  }
 0x651   :  { %v2377_v62 = vld [vmem:[%s3430_s5 + $0x10] sm:$0xff]  }
 0x652   :  { %2465 = vpow2.f32 %v2269_v23  ;;  %v2376_v23 = vld [vmem:[%s3430_s5 + $0x8] sm:$0xff]  }
 0x653   :  { %2467 = vpow2.f32 %v2270_v15  ;;  %v2378_v15 = vld [vmem:[%s3430_s5 + $0x18] sm:$0xff]  }
 0x65a   :  { %v2464_v22 = vpop.eup %2463 }
 0x65b   :  { %v1752_v43 = vadd.f32 1.0, %v2464_v22  ;;  %v2379_v22 = vld [vmem:[%s3430_s5 + $0x20] sm:$0xff]  }
 0x65c   :  { %v2466_v44 = vpop.eup %2465 }
 0x65d   :  { %2469 = vrcp.f32 %v1752_v43  ;;  %v1761_v46 = vadd.f32 1.0, %v2466_v44  ;;  %v2468_v47 = vpop.eup %2467  ;;  %v2381_v43 = vld [vmem:[%s3430_s5 + $0x30] sm:$0xff]   ;;  %v2382_v44 = vld [vmem:[%s3430_s5 + $0x38] sm:$0xff]  }
 0x65e   :  { %2471 = vtanh.f32 %v1764_v60  ;;  %v1772_v53 = vadd.f32 1.0, %v2468_v47  ;;  %v2380_v60 = vld [vmem:[%s3430_s5 + $0x28] sm:$0xff]  }
 0x65f   :  { %2473 = vrcp.f32 %v1761_v46 }
 0x660   :  { %2475 = vrcp.f32 %v1772_v53 }
 0x667   :  { %v2470_v50 = vpop.eup %2469 }
 0x668   :  { %v2472_v61 = vpop.eup %2471 }
 0x669   :  { %v2474_v51 = vpop.eup %2473  ;;  %v1776_v54 = vmul.f32 %v2472_v61, %v2470_v50 }
 0x66a   :  { %v1775_v26 = vmul.f32 %v2474_v51, %v3277_v45  ;;  %v2476_v57 = vpop.eup %2475 }
 0x66c   :  { %v3337_v56 = vadd.f32 %v1776_v54, %v1775_v26 }
 0x66e   :  { %2477 = vtanh.f32 %v3337_v56 }
 0x678   :  { %v2478_v58 = vpop.eup %2477 }
 0x679   :  { %v1779_v59 = vmul.f32 %v2478_v58, %v2476_v57 }
 0x67b   :  { %v1785_v19 = vpack.c.bf16 %v1779_v59, %v1779_v59  ;;  %v3342_v48 = vsel %vm1780_vm6, %v1779_v59, %v3282_v49 }
 0x67d   :  { %1819 = vmatmul.mubr.bf16.vlgmr.msra.gmra.mrb[24].mxu0 %v1785_v19  ;;  %1860 = vmatmul.mubr.bf16.vlgmr.msra.gmra.mrb[32].mxu1 %v1785_v19 }
 0x67e   :  { %1929 = vmatpush1.bf16.msra.mxu0 %v3105_v31  ;;  %1970 = vmatpush1.bf16.msra.mxu1 %v3111_v16 }
 0x67f   :  { %1930 = vmatprep.subr.bf16.mxu0 %v3117_v12  ;;  %1971 = vmatprep.subr.bf16.mxu1 %v3123_v32 }
 0x680   :  { %1960 = vmatprep.mubr.bf16.mxu0 %v3449_v55  ;;  %2001 = vmatprep.mubr.bf16.mxu1 %v3449_v55 }
 0x682   :  { %1931 = vmatpush1.bf16.msra.mxu0 %v3131_v34  ;;  %1972 = vmatpush1.bf16.msra.mxu1 %v3137_v63 }
 0x683   :  { %1932 = vmatprep.subr.bf16.mxu0 %v3143_v2  ;;  %1973 = vmatprep.subr.bf16.mxu1 %v3149_v11  ;;  %v3376_v11 = vld [vmem:[#allocation2 + $0x18] sm:$0xff]  }
 0x684   :  { %v1926_v19 = vunpack.c.h.bf16 %v3376_v11 }
 0x686   :  { %1933 = vmatpush1.bf16.msra.mxu0 %v3155_v35  ;;  %1974 = vmatpush1.bf16.msra.mxu1 %v3161_v21 }
 0x687   :  { %1934 = vmatprep.subr.bf16.mxu0 %v3167_v1  ;;  %1975 = vmatprep.subr.bf16.mxu1 %v3173_v20 }
 0x68a   :  { %1935 = vmatpush1.bf16.msra.mxu0 %v3179_v3  ;;  %1976 = vmatpush1.bf16.msra.mxu1 %v3185_v4  ;;  %v1784_v3 = vunpack.c.l.bf16 %v3376_v11 }
 0x68b   :  { %1936 = vmatprep.subr.bf16.mxu0 %v3191_v7  ;;  %1977 = vmatprep.subr.bf16.mxu1 %v3197_v8 }
 0x68e   :  { %1937 = vmatpush1.bf16.msra.mxu0 %v3203_v0  ;;  %1978 = vmatpush1.bf16.msra.mxu1 %v3209_v14 }
 0x68f   :  { %1938 = vmatprep.subr.bf16.mxu0 %v3215_v30  ;;  %1979 = vmatprep.subr.bf16.mxu1 %v3221_v33 }
 0x692   :  { %1939 = vmatpush1.bf16.msra.mxu0 %v3227_v36  ;;  %1980 = vmatpush1.bf16.msra.mxu1 %v3233_v37 }
 0x693   :  { %1940 = vmatprep.subr.bf16.mxu0 %v3239_v38  ;;  %1981 = vmatprep.subr.bf16.mxu1 %v3245_v39 }
 0x696   :  { %1941 = vmatpush1.bf16.msra.mxu0 %v3251_v40  ;;  %1982 = vmatpush1.bf16.msra.mxu1 %v3314_v28 }
 0x697   :  { %1942 = vmatprep.subr.bf16.mxu0 %v3258_v41  ;;  %1983 = vmatprep.subr.bf16.mxu1 %v3321_v24 }
 0x69a   :  { %1943 = vmatpush1.bf16.msra.mxu0 %v3265_v42  ;;  %1984 = vmatpush1.bf16.msra.mxu1 %v3328_v52 }
 0x69b   :  { %2295 = vmatprep.subr.bf16.mxu0 %v2546_v10 }
 0x750   :  { %v1820_v55 = vpop.f32.mrb[24].mxu0  ;;  %v1861_v31 = vpop.f32.mrb[32].mxu1 }
 0x751   :  { %v1822_v16 = vpop.f32.mrb[25].mxu0  ;;  %v1863_v12 = vpop.f32.mrb[33].mxu1 }
 0x752   :  { %v1872_v32 = vcombine.low %v1820_v55, %v1822_v16  ;;  %v1873_v34 = vcombine.low %v1861_v31, %v1863_v12  ;;  %v1824_v63 = vpop.f32.mrb[26].mxu0  ;;  %v1865_v2 = vpop.f32.mrb[34].mxu1 }
 0x753   :  { %v1825_v35 = vpop.f32.mrb[27].mxu0  ;;  %v1866_v21 = vpop.f32.mrb[35].mxu1 }
 0x754   :  { %v1880_v1 = vrot.slane %v1872_v32, %v2624_v18  ;;  %v1887_v20 = vrot.slane %v1873_v34, %v2624_v18 }
 0x756   :  { %v1888_v4 = vcombine.low %v1880_v1, %v1887_v20 }
 0x758   :  { %v1890_v7 = vadd.f32 %v1888_v4, %v1784_v3 }
 0x75a   :  { %v2271_v8 = vmul.f32 -1.442695, %v1890_v7  ;;  %v1898_v0 = vrot.slane %v1890_v7, 2  ;;  %v1909_v30 = vrot.slane %v1890_v7, 6  ;;  %v1906_v37 = vrot.slane %v1890_v7, 4 }
 0x75c   :  { %2479 = vpow2.f32 %v2271_v8  ;;  %v2272_v14 = vmul.f32 -1.442695, %v1898_v0  ;;  %v2273_v33 = vmul.f32 -1.442695, %v1909_v30 }
 0x75e   :  { %2481 = vpow2.f32 %v2272_v14 }
 0x75f   :  { %2483 = vpow2.f32 %v2273_v33 }
 0x766   :  { %v2480_v36 = vpop.eup %2479 }
 0x767   :  { %v1894_v38 = vadd.f32 1.0, %v2480_v36 }
 0x768   :  { %v2482_v39 = vpop.eup %2481 }
 0x769   :  { %2485 = vrcp.f32 %v1894_v38  ;;  %v1903_v40 = vadd.f32 1.0, %v2482_v39  ;;  %v2484_v41 = vpop.eup %2483  ;;  %v2277_v38 = vld [vmem:[%s3431_s6] ss:$0 sm:$0xff] }
 0x76a   :  { %2487 = vtanh.f32 %v1906_v37  ;;  %v1914_v28 = vadd.f32 1.0, %v2484_v41 }
 0x76b   :  { %2489 = vrcp.f32 %v1903_v40 }
 0x76c   :  { %2491 = vrcp.f32 %v1914_v28 }
 0x773   :  { %v2486_v42 = vpop.eup %2485 }
 0x774   :  { %v2488_v45 = vpop.eup %2487 }
 0x775   :  { %v2490_v49 = vpop.eup %2489  ;;  %v1918_v52 = vmul.f32 %v2488_v45, %v2486_v42 }
 0x776   :  { %v1917_v24 = vmul.f32 %v2490_v49, %v3337_v56  ;;  %v2492_v9 = vpop.eup %2491 }
 0x778   :  { %v3382_v6 = vadd.f32 %v1918_v52, %v1917_v24 }
 0x77a   :  { %2493 = vtanh.f32 %v3382_v6 }
 0x784   :  { %v2494_v13 = vpop.eup %2493 }
 0x785   :  { %v1921_v17 = vmul.f32 %v2494_v13, %v2492_v9 }
 0x787   :  { %v1927_v27 = vpack.c.bf16 %v1921_v17, %v1921_v17  ;;  %v3387_v25 = vsel %vm1922_vm7, %v1921_v17, %v3342_v48 }
 0x789   :  { %1961 = vmatmul.mubr.bf16.vlgmr.msra.gmra.mrb[28].mxu0 %v1927_v27  ;;  %2002 = vmatmul.mubr.bf16.vlgmr.msra.gmra.mrb[36].mxu1 %v1927_v27 }
 0x78a   :  { %2311 = vmatprep.mubr.msk.bf16.mxu0 %vm2547_vm8, %v2546_v10  ;;  %2296 = vmatpush3.bf16.msra.mxu0 %v2375_v29 }
 0x78b   :  { %2297 = vmatprep.subr.bf16.mxu0 %v2546_v10 }
 0x78e   :  { %2298 = vmatpush3.bf16.msra.mxu0 %v2376_v23 }
 0x78f   :  { %2299 = vmatprep.subr.bf16.mxu0 %v2546_v10 }
 0x792   :  { %2300 = vmatpush3.bf16.msra.mxu0 %v2377_v62 }
 0x793   :  { %2301 = vmatprep.subr.bf16.mxu0 %v2546_v10 }
 0x796   :  { %2302 = vmatpush3.bf16.msra.mxu0 %v2378_v15 }
 0x797   :  { %2303 = vmatprep.subr.bf16.mxu0 %v2546_v10 }
 0x79a   :  { %2304 = vmatpush3.bf16.msra.mxu0 %v2379_v22 }
 0x79b   :  { %2305 = vmatprep.subr.bf16.mxu0 %v2546_v10 }
 0x79e   :  { %2306 = vmatpush3.bf16.msra.mxu0 %v2380_v60 }
 0x79f   :  { %2307 = vmatprep.subr.bf16.mxu0 %v2546_v10 }
 0x7a2   :  { %2308 = vmatpush3.bf16.msra.mxu0 %v2381_v43 }
 0x7a3   :  { %2309 = vmatprep.subr.bf16.mxu0 %v2546_v10 }
 0x7a6   :  { %2310 = vmatpush3.bf16.msra.mxu0 %v2382_v44 }
 0x85c   :  { %v1962_v46 = vpop.f32.mrb[28].mxu0  ;;  %v2003_v47 = vpop.f32.mrb[36].mxu1 }
 0x85d   :  { %v1964_v50 = vpop.f32.mrb[29].mxu0  ;;  %v2005_v61 = vpop.f32.mrb[37].mxu1 }
 0x85e   :  { %v2014_v51 = vcombine.low %v1962_v46, %v1964_v50  ;;  %v2015_v53 = vcombine.low %v2003_v47, %v2005_v61  ;;  %v1966_v26 = vpop.f32.mrb[30].mxu0  ;;  %v2007_v54 = vpop.f32.mrb[38].mxu1 }
 0x85f   :  { %v1967_v56 = vpop.f32.mrb[31].mxu0  ;;  %v2008_v57 = vpop.f32.mrb[39].mxu1 }
 0x860   :  { %v2022_v58 = vrot.slane %v2014_v51, %v2624_v18  ;;  %v2029_v59 = vrot.slane %v2015_v53, %v2624_v18 }
 0x862   :  { %v2030_v48 = vcombine.low %v2022_v58, %v2029_v59 }
 0x864   :  { %v2032_v55 = vadd.f32 %v2030_v48, %v1926_v19 }
 0x866   :  { %v2274_v31 = vmul.f32 -1.442695, %v2032_v55  ;;  %v2040_v16 = vrot.slane %v2032_v55, 2  ;;  %v2051_v32 = vrot.slane %v2032_v55, 6  ;;  %v2048_v2 = vrot.slane %v2032_v55, 4 }
 0x868   :  { %2495 = vpow2.f32 %v2274_v31  ;;  %v2275_v12 = vmul.f32 -1.442695, %v2040_v16  ;;  %v2276_v34 = vmul.f32 -1.442695, %v2051_v32 }
 0x86a   :  { %2497 = vpow2.f32 %v2275_v12 }
 0x86b   :  { %2499 = vpow2.f32 %v2276_v34 }
 0x872   :  { %v2496_v63 = vpop.eup %2495 }
 0x873   :  { %v2036_v35 = vadd.f32 1.0, %v2496_v63 }
 0x874   :  { %v2498_v21 = vpop.eup %2497 }
 0x875   :  { %2501 = vrcp.f32 %v2036_v35  ;;  %v2045_v1 = vadd.f32 1.0, %v2498_v21  ;;  %v2500_v18 = vpop.eup %2499 }
 0x876   :  { %2503 = vtanh.f32 %v2048_v2  ;;  %v2056_v4 = vadd.f32 1.0, %v2500_v18 }
 0x877   :  { %2505 = vrcp.f32 %v2045_v1 }
 0x878   :  { %2507 = vrcp.f32 %v2056_v4 }
 0x87f   :  { %v2502_v11 = vpop.eup %2501 }
 0x880   :  { %v2504_v20 = vpop.eup %2503 }
 0x881   :  { %v2506_v3 = vpop.eup %2505  ;;  %v2060_v8 = vmul.f32 %v2504_v20, %v2502_v11 }
 0x882   :  { %v2059_v7 = vmul.f32 %v2506_v3, %v3382_v6  ;;  %v2508_v14 = vpop.eup %2507 }
 0x884   :  { %v2061_v0 = vadd.f32 %v2060_v8, %v2059_v7 }
 0x886   :  { %2509 = vtanh.f32 %v2061_v0 }
 0x890   :  { %v2510_v30 = vpop.eup %2509 }
 0x891   :  { %v2063_v33 = vmul.f32 %v2510_v30, %v2508_v14 }
 0x893   :  { %v2065_v36 = vsel %vm2064_vm9, %v2063_v33, %v3387_v25 }
 0x894   :  { %v2066_v37 = vpack.c.bf16 %v2065_v36, %v2065_v36 }
 0x896   :  { %2312 = vmatmul.mubr.bf16.vlgmr.msra.gmra.mrb[32].mxu0 %v2066_v37 }
 0x969   :  { %v2172_v39 = vpop.f32.mrb[32].mxu0 }
 0x96a   :  { %v2173_v40 = vadd.f32 %v2277_v38, %v2172_v39  ;;  %v2313_v41 = vpop.f32.mrb[33].mxu0 }
 0x96b   :  { %v2175_v42 = vpop.f32.mrb[34].mxu0 }
 0x96c   :  { %2178 = vst [vmem:[%s3432_s7] sm:$0x3] %v2173_v40  ;;  %v2314_v45 = vpop.f32.mrb[35].mxu0 }

</bundles_post_ra>
